<compile_context>
chip_gen: v7x
topology: tpu7x:2x2x1
jax: 0.10.0
libtpu: 0.0.40
codegen_flags: <defaults>
</compile_context>

<pallas_src>
import functools

import jax
import jax.numpy as jnp
from jax.experimental import pallas as pl
from jax.experimental.pallas import tpu as pltpu


def _round_up(v, m):
    return (v + m - 1) // m * m


def _pick_oc_tile(oc_pad):
    """Largest multiple-of-128 tile <= 512 that divides oc_pad."""
    if oc_pad <= 512:
        return oc_pad
    for cand in (512, 384, 256, 128):
        if oc_pad % cand == 0:
            return cand
    return 128


def conv_bn_relu_kernel(x_ref, w_ref, bias_ref, o_ref, *, k, stride, oh, ow):
    """Fused conv (K*K shifted matmuls) + folded-BN bias + ReLU.

    One grid step = one image x one OC tile.

    x_ref:    (1, HP, WP, C)         bf16  spatially-padded NHWC input
    w_ref:    (K*K, C, OC_tile)      bf16  BN-scale-folded weights
    bias_ref: (1, OC_tile)           f32   folded conv-bias/BN bias
    o_ref:    (1, OH*OW, OC_tile)    f32   lane-dense output tile
    """
    c = x_ref.shape[-1]
    oc_t = o_ref.shape[-1]
    m = oh * ow
    # Initialize the f32 accumulator with the folded bias (epilogue = ReLU only).
    acc = jnp.broadcast_to(bias_ref[...], (m, oc_t)).astype(jnp.float32)
    for idx in range(k * k):  # static unroll: K*K small shifted MXU matmuls
        i, j = divmod(idx, k)
        if stride == 1:
            xs = x_ref[0, pl.ds(i, oh), pl.ds(j, ow), :]
        else:
            xs = x_ref[0, pl.ds(i, oh, stride), pl.ds(j, ow, stride), :]
        acc = acc + jnp.dot(xs.reshape(m, c), w_ref[idx],
                            preferred_element_type=jnp.float32)
    o_ref[0] = jnp.maximum(acc, 0.0).astype(o_ref.dtype)


@functools.partial(jax.jit,
                   static_argnames=("kernel_size", "stride", "padding"))
def basic_conv2d(x, conv_w, conv_b, gamma, beta, running_mean, running_var,
                 *, kernel_size, stride=1, padding=0, eps=1e-5):
    """x: (N, C, H, W) f32.  conv_w: (OC, C, KH, KW).  Returns (N, OC, OH, OW)."""
    n, c, h, w = x.shape
    oc = conv_w.shape[0]
    k = kernel_size
    oh = (h + 2 * padding - k) // stride + 1
    ow = (w + 2 * padding - k) // stride + 1
    oc_pad = _round_up(oc, 128)
    oc_tile = _pick_oc_tile(oc_pad)
    n_oc_blocks = oc_pad // oc_tile
    hp, wp = h + 2 * padding, w + 2 * padding

    # NHWC, spatially padded, bf16 for the MXU (tiny vs. a K*K im2col blowup).
    x_nhwc = jnp.transpose(x, (0, 2, 3, 1))
    x_pad = jnp.pad(
        x_nhwc, ((0, 0), (padding, padding), (padding, padding), (0, 0))
    ).astype(jnp.bfloat16)

    # Fold eval-mode BN into a per-output-channel scale (into weights) + bias.
    inv_std = 1.0 / jnp.sqrt(running_var.astype(jnp.float32) + eps)
    scale = gamma.astype(jnp.float32) * inv_std                        # (OC,)
    bias = beta.astype(jnp.float32) + (conv_b - running_mean) * scale  # (OC,)

    # (OC, C, KH, KW) -> (KH*KW, C, OC), scale folded, zero-padded to OC_pad.
    w_kco = jnp.transpose(conv_w.astype(jnp.float32), (2, 3, 1, 0)).reshape(
        k * k, c, oc) * scale[None, None, :]
    w_kco = jnp.pad(w_kco, ((0, 0), (0, 0), (0, oc_pad - oc))).astype(
        jnp.bfloat16)
    bias2d = jnp.pad(bias, (0, oc_pad - oc)).reshape(1, oc_pad)

    kernel = functools.partial(conv_bn_relu_kernel,
                               k=k, stride=stride, oh=oh, ow=ow)

    flops = 2 * n * oh * ow * c * k * k * oc_pad
    bytes_accessed = (x_pad.size * 2 + w_kco.size * 2 + bias2d.size * 4
                      + n * oh * ow * oc_pad * 4)

    out3d = pl.pallas_call(
        kernel,
        out_shape=jax.ShapeDtypeStruct((n, oh * ow, oc_pad), jnp.float32),
        grid_spec=pltpu.PrefetchScalarGridSpec(
            num_scalar_prefetch=0,
            grid=(n, n_oc_blocks),
            in_specs=[
                # Input block index is constant along the OC-tile axis, so the
                # image slab stays resident in VMEM across OC tiles (no re-DMA).
                pl.BlockSpec((1, hp, wp, c), lambda b, j: (b, 0, 0, 0)),
                pl.BlockSpec((k * k, c, oc_tile), lambda b, j: (0, 0, j)),
                pl.BlockSpec((1, oc_tile), lambda b, j: (0, j)),
            ],
            out_specs=pl.BlockSpec((1, oh * ow, oc_tile),
                                   lambda b, j: (b, 0, j)),
        ),
        compiler_params=pltpu.CompilerParams(
            dimension_semantics=("parallel", "parallel"),
            vmem_limit_bytes=32 * 1024 * 1024,   # explicit; safe on v7x 64 MiB
        ),
        cost_estimate=pl.CostEstimate(flops=flops, transcendentals=0,
                                      bytes_accessed=bytes_accessed),
    )(x_pad, w_kco, bias2d)

    # Drop padded channels; back to NCHW to match the PyTorch module's output.
    # (NHWC consumers could skip this final transpose.)
    out_nhwc = out3d[:, :, :oc].reshape(n, oh, ow, oc)
    return jnp.transpose(out_nhwc, (0, 3, 1, 2))


def _reference(x, conv_w, conv_b, gamma, beta, running_mean, running_var,
               *, stride, padding, eps=1e-5):
    y = jax.lax.conv_general_dilated(
        x, conv_w, window_strides=(stride, stride),
        padding=((padding, padding), (padding, padding)),
        dimension_numbers=("NCHW", "OIHW", "NCHW"))
    y = y + conv_b[None, :, None, None]
    y = (y - running_mean[None, :, None, None]) / jnp.sqrt(
        running_var[None, :, None, None] + eps)
    y = y * gamma[None, :, None, None] + beta[None, :, None, None]
    return jnp.maximum(y, 0.0)


if __name__ == "__main__":
    key = jax.random.PRNGKey(0)
    k_x, k_w, k_b, k_m, k_v = jax.random.split(key, 5)

    # Small shapes consistent with the module: BasicConv2d(4, 8, 3, 1, 1)
    N, C, H, W = 2, 4, 16, 16
    OC, K, STRIDE, PAD = 8, 3, 1, 1

    x = jax.random.normal(k_x, (N, C, H, W), dtype=jnp.float32)
    conv_w = jax.random.normal(k_w, (OC, C, K, K), dtype=jnp.float32) * 0.1
    conv_b = jax.random.normal(k_b, (OC,), dtype=jnp.float32) * 0.1

    # Deterministic BN parameters (eval-mode running statistics).
    gamma = jnp.linspace(0.5, 1.5, OC, dtype=jnp.float32)
    beta = jnp.linspace(-0.2, 0.2, OC, dtype=jnp.float32)
    running_mean = jax.random.normal(k_m, (OC,), dtype=jnp.float32) * 0.05
    running_var = jnp.abs(jax.random.normal(k_v, (OC,), dtype=jnp.float32)) + 0.9

    out = basic_conv2d(x, conv_w, conv_b, gamma, beta, running_mean,
                       running_var, kernel_size=K, stride=STRIDE, padding=PAD)
    out = jax.block_until_ready(out)

    ref = _reference(x, conv_w, conv_b, gamma, beta, running_mean, running_var,
                     stride=STRIDE, padding=PAD)
    assert out.shape == (N, OC, H, W)
    # bf16 MXU inputs with f32 accumulation -> loosened tolerance.
    assert jnp.allclose(out, ref, atol=2e-2, rtol=2e-2), float(
        jnp.max(jnp.abs(out - ref)))

    print("KERNEL_OK")
</pallas_src>

<mosaic_0001>
module attributes {stable_mosaic.version = 11 : i64} {
  func.func @conv_bn_relu_kernel(%arg0: i32, %arg1: i32, %arg2: memref<1x18x18x4xbf16, #tpu.memory_space<vmem>>, %arg3: memref<9x4x128xbf16, #tpu.memory_space<vmem>>, %arg4: memref<1x128xf32, #tpu.memory_space<vmem>>, %arg5: memref<1x256x128xf32, #tpu.memory_space<vmem>>) attributes {dimension_semantics = [#tpu.dimension_semantics<parallel>, #tpu.dimension_semantics<parallel>], iteration_bounds = array<i64: 2, 1>, scalar_prefetch = 0 : i64, scratch_operands = 0 : i64, tpu.core_type = #tpu.core_type<tc>, window_params = [{transform_indices = @transform_0, window_bounds = array<i64: 1, 18, 18, 4>}, {transform_indices = @transform_1, window_bounds = array<i64: 9, 4, 128>}, {transform_indices = @transform_2, window_bounds = array<i64: 1, 128>}, {transform_indices = @transform_3, window_bounds = array<i64: 1, 256, 128>}]} {
    %c0 = arith.constant 0 : index
    %c0_0 = arith.constant 0 : index
    %0 = vector.load %arg4[%c0, %c0_0] : memref<1x128xf32, #tpu.memory_space<vmem>>, vector<1x128xf32>
    %1 = vector.shape_cast %0 : vector<1x128xf32> to vector<1x128xf32>
    %2 = vector.broadcast %1 : vector<1x128xf32> to vector<256x128xf32>
    %c0_1 = arith.constant 0 : index
    %c0_2 = arith.constant 0 : index
    %c0_3 = arith.constant 0 : index
    %c0_4 = arith.constant 0 : index
    %3 = vector.load %arg2[%c0_1, %c0_2, %c0_3, %c0_4] : memref<1x18x18x4xbf16, #tpu.memory_space<vmem>>, vector<1x16x16x4xbf16>
    %4 = vector.shape_cast %3 : vector<1x16x16x4xbf16> to vector<16x16x4xbf16>
    %5 = vector.shape_cast %4 : vector<16x16x4xbf16> to vector<256x4xbf16>
    %c0_5 = arith.constant 0 : index
    %c0_6 = arith.constant 0 : index
    %c0_7 = arith.constant 0 : index
    %6 = vector.load %arg3[%c0_5, %c0_6, %c0_7] : memref<9x4x128xbf16, #tpu.memory_space<vmem>>, vector<1x4x128xbf16>
    %7 = vector.shape_cast %6 : vector<1x4x128xbf16> to vector<4x128xbf16>
    %cst = arith.constant dense<0.000000e+00> : vector<256x128xf32>
    %8 = tpu.matmul %5, %7, %cst {dimension_numbers = #tpu.dot_dimension_numbers<[1], [0], [0], [1], [0, 0, 1, 1], [], []>} : vector<256x4xbf16>, vector<4x128xbf16>, vector<256x128xf32> -> vector<256x128xf32>
    %9 = arith.addf %2, %8 : vector<256x128xf32>
    %c0_8 = arith.constant 0 : index
    %c0_9 = arith.constant 0 : index
    %c1 = arith.constant 1 : index
    %c0_10 = arith.constant 0 : index
    %10 = vector.load %arg2[%c0_8, %c0_9, %c1, %c0_10] : memref<1x18x18x4xbf16, #tpu.memory_space<vmem>>, vector<1x16x16x4xbf16>
    %11 = vector.shape_cast %10 : vector<1x16x16x4xbf16> to vector<16x16x4xbf16>
    %12 = vector.shape_cast %11 : vector<16x16x4xbf16> to vector<256x4xbf16>
    %c1_11 = arith.constant 1 : index
    %c0_12 = arith.constant 0 : index
    %c0_13 = arith.constant 0 : index
    %13 = vector.load %arg3[%c1_11, %c0_12, %c0_13] : memref<9x4x128xbf16, #tpu.memory_space<vmem>>, vector<1x4x128xbf16>
    %14 = vector.shape_cast %13 : vector<1x4x128xbf16> to vector<4x128xbf16>
    %cst_14 = arith.constant dense<0.000000e+00> : vector<256x128xf32>
    %15 = tpu.matmul %12, %14, %cst_14 {dimension_numbers = #tpu.dot_dimension_numbers<[1], [0], [0], [1], [0, 0, 1, 1], [], []>} : vector<256x4xbf16>, vector<4x128xbf16>, vector<256x128xf32> -> vector<256x128xf32>
    %16 = arith.addf %9, %15 : vector<256x128xf32>
    %c0_15 = arith.constant 0 : index
    %c0_16 = arith.constant 0 : index
    %c2 = arith.constant 2 : index
    %c0_17 = arith.constant 0 : index
    %17 = vector.load %arg2[%c0_15, %c0_16, %c2, %c0_17] : memref<1x18x18x4xbf16, #tpu.memory_space<vmem>>, vector<1x16x16x4xbf16>
    %18 = vector.shape_cast %17 : vector<1x16x16x4xbf16> to vector<16x16x4xbf16>
    %19 = vector.shape_cast %18 : vector<16x16x4xbf16> to vector<256x4xbf16>
    %c2_18 = arith.constant 2 : index
    %c0_19 = arith.constant 0 : index
    %c0_20 = arith.constant 0 : index
    %20 = vector.load %arg3[%c2_18, %c0_19, %c0_20] : memref<9x4x128xbf16, #tpu.memory_space<vmem>>, vector<1x4x128xbf16>
    %21 = vector.shape_cast %20 : vector<1x4x128xbf16> to vector<4x128xbf16>
    %cst_21 = arith.constant dense<0.000000e+00> : vector<256x128xf32>
    %22 = tpu.matmul %19, %21, %cst_21 {dimension_numbers = #tpu.dot_dimension_numbers<[1], [0], [0], [1], [0, 0, 1, 1], [], []>} : vector<256x4xbf16>, vector<4x128xbf16>, vector<256x128xf32> -> vector<256x128xf32>
    %23 = arith.addf %16, %22 : vector<256x128xf32>
    %c0_22 = arith.constant 0 : index
    %c1_23 = arith.constant 1 : index
    %c0_24 = arith.constant 0 : index
    %c0_25 = arith.constant 0 : index
    %24 = vector.load %arg2[%c0_22, %c1_23, %c0_24, %c0_25] : memref<1x18x18x4xbf16, #tpu.memory_space<vmem>>, vector<1x16x16x4xbf16>
    %25 = vector.shape_cast %24 : vector<1x16x16x4xbf16> to vector<16x16x4xbf16>
    %26 = vector.shape_cast %25 : vector<16x16x4xbf16> to vector<256x4xbf16>
    %c3 = arith.constant 3 : index
    %c0_26 = arith.constant 0 : index
    %c0_27 = arith.constant 0 : index
    %27 = vector.load %arg3[%c3, %c0_26, %c0_27] : memref<9x4x128xbf16, #tpu.memory_space<vmem>>, vector<1x4x128xbf16>
    %28 = vector.shape_cast %27 : vector<1x4x128xbf16> to vector<4x128xbf16>
    %cst_28 = arith.constant dense<0.000000e+00> : vector<256x128xf32>
    %29 = tpu.matmul %26, %28, %cst_28 {dimension_numbers = #tpu.dot_dimension_numbers<[1], [0], [0], [1], [0, 0, 1, 1], [], []>} : vector<256x4xbf16>, vector<4x128xbf16>, vector<256x128xf32> -> vector<256x128xf32>
    %30 = arith.addf %23, %29 : vector<256x128xf32>
    %c0_29 = arith.constant 0 : index
    %c1_30 = arith.constant 1 : index
    %c1_31 = arith.constant 1 : index
    %c0_32 = arith.constant 0 : index
    %31 = vector.load %arg2[%c0_29, %c1_30, %c1_31, %c0_32] : memref<1x18x18x4xbf16, #tpu.memory_space<vmem>>, vector<1x16x16x4xbf16>
    %32 = vector.shape_cast %31 : vector<1x16x16x4xbf16> to vector<16x16x4xbf16>
    %33 = vector.shape_cast %32 : vector<16x16x4xbf16> to vector<256x4xbf16>
    %c4 = arith.constant 4 : index
    %c0_33 = arith.constant 0 : index
    %c0_34 = arith.constant 0 : index
    %34 = vector.load %arg3[%c4, %c0_33, %c0_34] : memref<9x4x128xbf16, #tpu.memory_space<vmem>>, vector<1x4x128xbf16>
    %35 = vector.shape_cast %34 : vector<1x4x128xbf16> to vector<4x128xbf16>
    %cst_35 = arith.constant dense<0.000000e+00> : vector<256x128xf32>
    %36 = tpu.matmul %33, %35, %cst_35 {dimension_numbers = #tpu.dot_dimension_numbers<[1], [0], [0], [1], [0, 0, 1, 1], [], []>} : vector<256x4xbf16>, vector<4x128xbf16>, vector<256x128xf32> -> vector<256x128xf32>
    %37 = arith.addf %30, %36 : vector<256x128xf32>
    %c0_36 = arith.constant 0 : index
    %c1_37 = arith.constant 1 : index
    %c2_38 = arith.constant 2 : index
    %c0_39 = arith.constant 0 : index
    %38 = vector.load %arg2[%c0_36, %c1_37, %c2_38, %c0_39] : memref<1x18x18x4xbf16, #tpu.memory_space<vmem>>, vector<1x16x16x4xbf16>
    %39 = vector.shape_cast %38 : vector<1x16x16x4xbf16> to vector<16x16x4xbf16>
    %40 = vector.shape_cast %39 : vector<16x16x4xbf16> to vector<256x4xbf16>
    %c5 = arith.constant 5 : index
    %c0_40 = arith.constant 0 : index
    %c0_41 = arith.constant 0 : index
    %41 = vector.load %arg3[%c5, %c0_40, %c0_41] : memref<9x4x128xbf16, #tpu.memory_space<vmem>>, vector<1x4x128xbf16>
    %42 = vector.shape_cast %41 : vector<1x4x128xbf16> to vector<4x128xbf16>
    %cst_42 = arith.constant dense<0.000000e+00> : vector<256x128xf32>
    %43 = tpu.matmul %40, %42, %cst_42 {dimension_numbers = #tpu.dot_dimension_numbers<[1], [0], [0], [1], [0, 0, 1, 1], [], []>} : vector<256x4xbf16>, vector<4x128xbf16>, vector<256x128xf32> -> vector<256x128xf32>
    %44 = arith.addf %37, %43 : vector<256x128xf32>
    %c0_43 = arith.constant 0 : index
    %c2_44 = arith.constant 2 : index
    %c0_45 = arith.constant 0 : index
    %c0_46 = arith.constant 0 : index
    %45 = vector.load %arg2[%c0_43, %c2_44, %c0_45, %c0_46] : memref<1x18x18x4xbf16, #tpu.memory_space<vmem>>, vector<1x16x16x4xbf16>
    %46 = vector.shape_cast %45 : vector<1x16x16x4xbf16> to vector<16x16x4xbf16>
    %47 = vector.shape_cast %46 : vector<16x16x4xbf16> to vector<256x4xbf16>
    %c6 = arith.constant 6 : index
    %c0_47 = arith.constant 0 : index
    %c0_48 = arith.constant 0 : index
    %48 = vector.load %arg3[%c6, %c0_47, %c0_48] : memref<9x4x128xbf16, #tpu.memory_space<vmem>>, vector<1x4x128xbf16>
    %49 = vector.shape_cast %48 : vector<1x4x128xbf16> to vector<4x128xbf16>
    %cst_49 = arith.constant dense<0.000000e+00> : vector<256x128xf32>
    %50 = tpu.matmul %47, %49, %cst_49 {dimension_numbers = #tpu.dot_dimension_numbers<[1], [0], [0], [1], [0, 0, 1, 1], [], []>} : vector<256x4xbf16>, vector<4x128xbf16>, vector<256x128xf32> -> vector<256x128xf32>
    %51 = arith.addf %44, %50 : vector<256x128xf32>
    %c0_50 = arith.constant 0 : index
    %c2_51 = arith.constant 2 : index
    %c1_52 = arith.constant 1 : index
    %c0_53 = arith.constant 0 : index
    %52 = vector.load %arg2[%c0_50, %c2_51, %c1_52, %c0_53] : memref<1x18x18x4xbf16, #tpu.memory_space<vmem>>, vector<1x16x16x4xbf16>
    %53 = vector.shape_cast %52 : vector<1x16x16x4xbf16> to vector<16x16x4xbf16>
    %54 = vector.shape_cast %53 : vector<16x16x4xbf16> to vector<256x4xbf16>
    %c7 = arith.constant 7 : index
    %c0_54 = arith.constant 0 : index
    %c0_55 = arith.constant 0 : index
    %55 = vector.load %arg3[%c7, %c0_54, %c0_55] : memref<9x4x128xbf16, #tpu.memory_space<vmem>>, vector<1x4x128xbf16>
    %56 = vector.shape_cast %55 : vector<1x4x128xbf16> to vector<4x128xbf16>
    %cst_56 = arith.constant dense<0.000000e+00> : vector<256x128xf32>
    %57 = tpu.matmul %54, %56, %cst_56 {dimension_numbers = #tpu.dot_dimension_numbers<[1], [0], [0], [1], [0, 0, 1, 1], [], []>} : vector<256x4xbf16>, vector<4x128xbf16>, vector<256x128xf32> -> vector<256x128xf32>
    %58 = arith.addf %51, %57 : vector<256x128xf32>
    %c0_57 = arith.constant 0 : index
    %c2_58 = arith.constant 2 : index
    %c2_59 = arith.constant 2 : index
    %c0_60 = arith.constant 0 : index
    %59 = vector.load %arg2[%c0_57, %c2_58, %c2_59, %c0_60] : memref<1x18x18x4xbf16, #tpu.memory_space<vmem>>, vector<1x16x16x4xbf16>
    %60 = vector.shape_cast %59 : vector<1x16x16x4xbf16> to vector<16x16x4xbf16>
    %61 = vector.shape_cast %60 : vector<16x16x4xbf16> to vector<256x4xbf16>
    %c8 = arith.constant 8 : index
    %c0_61 = arith.constant 0 : index
    %c0_62 = arith.constant 0 : index
    %62 = vector.load %arg3[%c8, %c0_61, %c0_62] : memref<9x4x128xbf16, #tpu.memory_space<vmem>>, vector<1x4x128xbf16>
    %63 = vector.shape_cast %62 : vector<1x4x128xbf16> to vector<4x128xbf16>
    %cst_63 = arith.constant dense<0.000000e+00> : vector<256x128xf32>
    %64 = tpu.matmul %61, %63, %cst_63 {dimension_numbers = #tpu.dot_dimension_numbers<[1], [0], [0], [1], [0, 0, 1, 1], [], []>} : vector<256x4xbf16>, vector<4x128xbf16>, vector<256x128xf32> -> vector<256x128xf32>
    %65 = arith.addf %58, %64 : vector<256x128xf32>
    %cst_64 = arith.constant 0.000000e+00 : f32
    %66 = vector.broadcast %cst_64 : f32 to vector<256x128xf32>
    %67 = arith.maximumf %65, %66 : vector<256x128xf32>
    %c0_65 = arith.constant 0 : index
    %c0_66 = arith.constant 0 : index
    %c0_67 = arith.constant 0 : index
    %68 = vector.load %arg5[%c0_65, %c0_66, %c0_67] : memref<1x256x128xf32, #tpu.memory_space<vmem>>, vector<1x256x128xf32>
    %69 = vector.shape_cast %68 : vector<1x256x128xf32> to vector<256x128xf32>
    %70 = vector.shape_cast %67 : vector<256x128xf32> to vector<1x256x128xf32>
    tpu.vector_store %arg5[%c0_65, %c0_66, %c0_67], %70 {strides = array<i32>} : memref<1x256x128xf32, #tpu.memory_space<vmem>>, vector<1x256x128xf32>,
    return
  }
  func.func @transform_0(%arg0: i32, %arg1: i32) -> (i32, i32, i32, i32) {
    %c0_i32 = arith.constant 0 : i32
    %c0_i32_0 = arith.constant 0 : i32
    %c0_i32_1 = arith.constant 0 : i32
    %c0_i32_2 = arith.constant 0 : i32
    return %arg0, %c0_i32, %c0_i32_0, %c0_i32_1 : i32, i32, i32, i32
  }
  func.func @transform_1(%arg0: i32, %arg1: i32) -> (i32, i32, i32) {
    %c0_i32 = arith.constant 0 : i32
    %c0_i32_0 = arith.constant 0 : i32
    %c0_i32_1 = arith.constant 0 : i32
    return %c0_i32, %c0_i32_0, %arg1 : i32, i32, i32
  }
  func.func @transform_2(%arg0: i32, %arg1: i32) -> (i32, i32) {
    %c0_i32 = arith.constant 0 : i32
    %c0_i32_0 = arith.constant 0 : i32
    return %c0_i32, %arg1 : i32, i32
  }
  func.func @transform_3(%arg0: i32, %arg1: i32) -> (i32, i32, i32) {
    %c0_i32 = arith.constant 0 : i32
    %c0_i32_0 = arith.constant 0 : i32
    return %arg0, %c0_i32, %arg1 : i32, i32, i32
  }
}

</mosaic_0001>

<bundles_post_ra>
// kernel: basic_conv2d.1
= control target key start
LH: loop header
LB: loop body
LE: loop exit
PB: predicated region body
PF: predicated region fallthrough
CT: control target
= control target key end

     0   :  { %s6512_s12 = smov 0   ;;  %s6514_s13 = smov 0   ;;  %s8192_s0 = inlined_call_operand.vmem [shape: bf16[2,18,18,4], index: 0, kind: input, shape index: {}]   ;;  %s8193_s1 = inlined_call_operand.vmem [shape: bf16[9,4,128], index: 1, kind: input, shape index: {}]   ;;  %s8194_s2 = inlined_call_operand.vmem [shape: f32[1,128], index: 2, kind: input, shape index: {}]   ;;  %s8195_s3 = inlined_call_operand.vmem [shape: f32[2,256,128], index: 3, kind: output, shape index: {}]  }
   0x1   :  { %s6516_s14 = smov 0  }
   0x2 LB: > { %s25_s15 = sadd.s32 1, %s6486_s13  ;;  %p5076_p0 = scmp.ge.s32.totalorder %s6490_s14, 1  ;;  %s6490_s14 = sphi %s6516_s14, %s13_s14   ;;  %s6486_s13 = sphi %s6514_s13, %s8203_s13   ;;  %s6482_s12 = sphi %s6512_s12, %s8202_s12  }
   0x3   : > { %p27_p1 = scmp.ge.s32.totalorder %s25_s15, 2  ;;  %p168_p2 = scmp.lt.s32.totalorder %s6490_s14, 3 }
   0x5   : > { %s8205_s15 = smov (%p27_p1, %s25_s15), 0  ;;  %p169_p3 = pnand %p5076_p0, %p168_p2 }
   0x6   : > { %v262_v0 = vld [vmem:[%s8193_s1] sm:$0x3] (!%p169_p3)  ;;  %vm392_vm0 = vcmask (!%p169_p3), 1041408   ;;  %p202_p4 = scmp.lt.s32.totalorder (!%p169_p3), %s6482_s12, 1  ;;  %v5308_v2 = vld [vmem:[%s8193_s1 + $0x8] sm:$0x3] (!%p169_p3) }
   0x7   : > { %172 = sbr.rel (%p169_p3) target bundleno = 541 (0x21d), region = 32  ;;  %6369 = vmatprep.subr.msk.bf16.mxu1 (!%p169_p3), %vm392_vm0, %v262_v0  ;;  %v394_v1 = vsel (!%p169_p3), %vm392_vm0, %v262_v0, 0  ;;  %v5113_v3 = vld [vmem:[%s8193_s1 + $0x2] sm:$0x3] (!%p169_p3)  ;;  %6373 = vmatprep.subr.msk.bf16.mxu0 (!%p169_p3), %vm392_vm0, %v5308_v2  ;;  %v6545_v4 = vsel (!%p169_p3), %vm392_vm0, %v5308_v2, 0  ;;  %vm343_vm1 = vcmask (!%p169_p3), 31744  }
   0x8   : > { %5774 = vmatpush3.bf16.msra.mxu1 (!%p169_p3), %v394_v1  ;;  %5910 = vmatpush3.bf16.msra.mxu0 (!%p169_p3), %v6545_v4  ;;  %v5373_v5 = vld [vmem:[%s8193_s1 + $0xa] sm:$0x3] (!%p169_p3)  ;;  %vm637_vm2 = vsmask.f32 (!%p169_p3), 3328  ;;  %vm638_vm3 = vsmask.f32 (!%p169_p3), 7440 }
   0x9   : > { %6370 = vmatprep.subr.msk.bf16.mxu1 (!%p169_p3), %vm392_vm0, %v5113_v3  ;;  %6375 = vmatprep.subr.msk.bf16.mxu0 (!%p169_p3), %vm392_vm0, %v5373_v5  ;;  %v6562_v6 = vld [vmem:[%s8193_s1 + $0xc] sm:$0x3] (!%p169_p3)  ;;  %v5162_v8 = vld [vmem:[%s8193_s1 + $0x4] sm:$0x3] (!%p169_p3)  ;;  %v1123_v10 = vsel (!%p169_p3), %vm392_vm0, %v5113_v3, 0  ;;  %v6574_v12 = vsel (!%p169_p3), %vm392_vm0, %v5373_v5, 0  ;;  %vm6614_vm4 = vmor (!%p169_p3), %vm637_vm2, %vm638_vm3 }
   0xa   : > { %v6578_v13 = vsel (!%p169_p3), %vm392_vm0, %v6562_v6, 0  ;;  %v6595_v22 = vld [vmem:[%s8193_s1 + $0xe] sm:$0x3] (!%p169_p3)  ;;  %v6603_v27 = vsel (!%p169_p3), %vm392_vm0, %v5162_v8, 0  ;;  %vm1382_vm5 = vcmask (!%p169_p3), 1042432   ;;  %vm1383_vm6 = vcmask (!%p169_p3), 1046532  }
   0xb   : > { %v6621_v46 = vsel (!%p169_p3), %vm392_vm0, %v6595_v22, 0  ;;  %vm6741_vm7 = vmor (!%p169_p3), %vm1382_vm5, %vm1383_vm6 }
   0xe   : > { %s8207_s12 = smov (!%p202_p4, %s6482_s12), 1 }
   0xf   : > { %s6379_s24 = smul.u32 216, %s8207_s12  ;;  %s5619_s19 = sshll.u32 %s8207_s12, 8 }
  0x10   : > { %s8117_s22 = scalar_lea.vmem %s8195_s3, %s5619_s19 }
  0x11   : > { %s6557_s27 = scalar_lea.vmem %s8192_s0, %s6379_s24 }
  0x12   : > { %v6404_v7 = vld [vmem:[%s6557_s27] sm:$0xff]   ;;  %v6405_v9 = vld [vmem:[%s6557_s27 + $0xc] sm:$0xff]   ;;  %v6406_v11 = vld [vmem:[%s6557_s27 + $0x18] sm:$0xff]  }
  0x13   : > { %5775 = vmatprep.mubr.msk.bf16.mxu1 %vm343_vm1, %v6404_v7  ;;  %v5260_v14 = vld [vmem:[%s6557_s27 + $0xc] sm:$0xf]  ;;  %v6583_v15 = vld [vmem:[%s6557_s27 + $0x10] sm:$0xf]  ;;  %v6586_v16 = vld [vmem:[%s6557_s27 + $0x14] sm:$0x1] }
  0x14   : > { %5776 = vmatmul.mubr.msk.bf16.vlgmr.msra.gmra.mrb[0].mxu1 %vm343_vm1, %v6405_v9  ;;  %v2199_v17 = vshrl.u32 %v5260_v14, 16  ;;  %v2202_v18 = vshll.u32 %v5260_v14, 16  ;;  %v2208_v19 = vshll.u32 %v6583_v15, 16  ;;  %v2212_v20 = vshrl.u32 %v6583_v15, 16  ;;  %v5263_v21 = vld [vmem:[%s6557_s27 + $0x18] sm:$0xf] }
  0x15   : > { %5779 = vmatprep.mubr.msk.bf16.mxu1 %vm343_vm1, %v6406_v11  ;;  %5808 = vmatpush3.bf16.msra.mxu1 %v1123_v10  ;;  %v6407_v23 = vld [vmem:[%s6557_s27 + $0x24] sm:$0xff]   ;;  %v2218_v24 = vshll.u32 %v6586_v16, 16  ;;  %v6600_v25 = vld [vmem:[%s6557_s27 + $0x1c] sm:$0xf]  ;;  %v2223_v26 = vshrl.u32 %v5263_v21, 16  ;;  %v2226_v35 = vshll.u32 %v5263_v21, 16 }
  0x16   : > { %6371 = vmatprep.subr.msk.bf16.mxu1 %vm392_vm0, %v5162_v8  ;;  %v2201_v28 = vrot.slane %v2199_v17, 4  ;;  %v2204_v29 = vrot.slane %v2202_v18, 5  ;;  %v2210_v30 = vrot.slane %v2208_v19, 5  ;;  %v2214_v31 = vrot.slane %v2212_v20, 4  ;;  %v6606_v32 = vld [vmem:[%s6557_s27 + $0x20] sm:$0x1] }
  0x17   : > { %v2220_v33 = vrot.slane %v2218_v24, 5  ;;  %v2225_v34 = vrot.slane %v2223_v26, 4  ;;  %v2232_v36 = vshll.u32 %v6600_v25, 16  ;;  %v2236_v39 = vshrl.u32 %v6600_v25, 16  ;;  %v6408_v41 = vld [vmem:[%s6557_s27 + $0x30] sm:$0xff]   ;;  %v6409_v0 = vld [vmem:[%s6557_s27 + $0x3c] sm:$0xff]  }
  0x18   : > { %v2205_v37 = vor.u32 %v2204_v29, %v2201_v28  ;;  %v2215_v38 = vor.u32 %v2214_v31, %v2210_v30  ;;  %v2242_v40 = vshll.u32 %v6606_v32, 16  ;;  %v2942_v43 = vrot.slane %v6583_v15, 5  ;;  %v5266_v54 = vld [vmem:[%s6557_s27 + $0x24] sm:$0xf]  ;;  %v6629_v55 = vld [vmem:[%s6557_s27 + $0x28] sm:$0xf] }
  0x19   : > { %v2228_v44 = vrot.slane %v2226_v35, 5  ;;  %v2234_v45 = vrot.slane %v2232_v36, 5  ;;  %v2945_v49 = vrot.slane %v6586_v16, 5  ;;  %v2238_v50 = vrot.slane %v2236_v39, 4  ;;  %v6636_v59 = vld [vmem:[%s6557_s27 + $0x2c] sm:$0x1] }
  0x1a   : > { %v2206_v47 = vrot.slane %v2205_v37, 4  ;;  %v2216_v48 = vrot.slane %v2215_v38, 4  ;;  %v2244_v52 = vrot.slane %v2242_v40, 5  ;;  %v2949_v53 = vrot.slane %v6600_v25, 5  ;;  %v5269_v61 = vld [vmem:[%s6557_s27 + $0x30] sm:$0xf] }
  0x1b   : > { %v2229_v51 = vor.u32 %v2228_v44, %v2225_v34  ;;  %v2239_v58 = vor.u32 %v2238_v50, %v2234_v45  ;;  %v2247_v60 = vshrl.u32 %v5266_v54, 16  ;;  %v2250_v1 = vshll.u32 %v5266_v54, 16  ;;  %v6642_v3 = vld [vmem:[%s6557_s27 + $0x34] sm:$0xf]  ;;  %v6647_v10 = vld [vmem:[%s6557_s27 + $0x38] sm:$0x1] }
  0x1c   : > { %5780 = vmatmul.mubr.msk.bf16.gmra.mrb[4].mxu1 %vm343_vm1, %v6407_v23  ;;  %v2211_v56 = vsel %vm6614_vm4, %v2206_v47, %v2210_v30  ;;  %v2221_v57 = vsel %vm6614_vm4, %v2216_v48, %v2220_v33  ;;  %v2256_v2 = vshll.u32 %v6629_v55, 16  ;;  %v2260_v8 = vshrl.u32 %v6629_v55, 16  ;;  %v6410_v19 = vld [vmem:[%s6557_s27 + $0x48] sm:$0xff]   ;;  %v5272_v36 = vld [vmem:[%s6557_s27 + $0x3c] sm:$0xf] }
  0x1d   : > { %5783 = vmatprep.mubr.msk.bf16.mxu1 %vm343_vm1, %v6408_v41  ;;  %v5309_v62 = vcombine.low %v2211_v56, %v2221_v57  ;;  %v2230_v63 = vrot.slane %v2229_v51, 4  ;;  %v2240_v5 = vrot.slane %v2239_v58, 4  ;;  %v2249_v7 = vrot.slane %v2247_v60, 4  ;;  %v6668_v41 = vld [vmem:[%s6557_s27 + $0x40] sm:$0xf] }
  0x1e   : > { %v2266_v9 = vshll.u32 %v6636_v59, 16  ;;  %v2252_v14 = vrot.slane %v2250_v1, 5  ;;  %v2258_v17 = vrot.slane %v2256_v2, 5  ;;  %v2271_v18 = vshrl.u32 %v5269_v61, 16  ;;  %v6672_v50 = vld [vmem:[%s6557_s27 + $0x44] sm:$0x1] }
  0x1f   : > { %5911 = vmatprep.mubr.msk.bf16.mxu0 %vm343_vm1, %v5309_v62  ;;  %v2235_v11 = vsel %vm6614_vm4, %v2230_v63, %v2234_v45  ;;  %v2245_v20 = vsel %vm6614_vm4, %v2240_v5, %v2244_v52  ;;  %v2262_v21 = vrot.slane %v2260_v8, 4  ;;  %v2274_v24 = vshll.u32 %v5269_v61, 16  ;;  %v6411_v52 = vld [vmem:[%s6557_s27 + $0x54] sm:$0xff]   ;;  %v5275_v58 = vld [vmem:[%s6557_s27 + $0x48] sm:$0xf]  ;;  %v6412_v8 = vld [vmem:[%s6557_s27 + $0x60] sm:$0xff]  }
  0x20   : > { %v2268_v23 = vrot.slane %v2266_v9, 5  ;;  %v5310_v26 = vcombine.low %v2235_v11, %v2245_v20  ;;  %v2253_v28 = vor.u32 %v2252_v14, %v2249_v7  ;;  %v2273_v29 = vrot.slane %v2271_v18, 4  ;;  %v6685_v63 = vld [vmem:[%s6557_s27 + $0x4c] sm:$0xf]  ;;  %v6688_v7 = vld [vmem:[%s6557_s27 + $0x50] sm:$0x1] }
  0x21   : > { %v2280_v30 = vshll.u32 %v6642_v3, 16  ;;  %v2263_v31 = vor.u32 %v2262_v21, %v2258_v17  ;;  %v2276_v33 = vrot.slane %v2274_v24, 5  ;;  %v2284_v34 = vshrl.u32 %v6642_v3, 16 }
  0x22   : > { %v2290_v35 = vshll.u32 %v6647_v10, 16  ;;  %5912 = vmatmul.mubr.msk.bf16.vlgmr.msra.gmra.mrb[0].mxu0 %vm343_vm1, %v5310_v26  ;;  %v6663_v37 = vrot.slane %v2949_v53, 4  ;;  %v2952_v38 = vrot.slane %v6606_v32, 5  ;;  %v2254_v39 = vrot.slane %v2253_v28, 4  ;;  %v5278_v28 = vld [vmem:[%s6557_s27 + $0x54] sm:$0xf] }
  0x23   : > { %v2282_v40 = vrot.slane %v2280_v30, 5  ;;  %5944 = vmatpush3.bf16.msra.mxu0 %v6574_v12  ;;  %v2264_v44 = vrot.slane %v2263_v31, 4  ;;  %v2277_v45 = vor.u32 %v2276_v33, %v2273_v29  ;;  %v2286_v47 = vrot.slane %v2284_v34, 4  ;;  %v6703_v34 = vld [vmem:[%s6557_s27 + $0x58] sm:$0xf] }
  0x24   : > { %5784 = vmatmul.mubr.msk.bf16.gmra.mrb[8].mxu1 %vm343_vm1, %v6409_v0  ;;  %v2292_v48 = vrot.slane %v2290_v35, 5  ;;  %v2259_v51 = vsel %vm6614_vm4, %v2254_v39, %v2258_v17  ;;  %v2295_v54 = vshrl.u32 %v5272_v36, 16  ;;  %v2298_v56 = vshll.u32 %v5272_v36, 16  ;;  %6376 = vmatprep.subr.msk.bf16.mxu0 %vm392_vm0, %v6562_v6 }
  0x25   : > { %5787 = vmatprep.mubr.msk.bf16.mxu1 %vm343_vm1, %v6410_v19  ;;  %v2304_v57 = vshll.u32 %v6668_v41, 16  ;;  %v2269_v12 = vsel %vm6614_vm4, %v2264_v44, %v2268_v23  ;;  %v2278_v60 = vrot.slane %v2277_v45, 4  ;;  %v2287_v61 = vor.u32 %v2286_v47, %v2282_v40  ;;  %v6413_v44 = vld [vmem:[%s6557_s27 + $0x6c] sm:$0xff]   ;;  %v6708_v45 = vld [vmem:[%s6557_s27 + $0x5c] sm:$0x1] }
  0x26   : > { %v2308_v62 = vshrl.u32 %v6668_v41, 16  ;;  %v5311_v0 = vcombine.low %v2259_v51, %v2269_v12  ;;  %v2297_v1 = vrot.slane %v2295_v54, 4  ;;  %v2300_v2 = vrot.slane %v2298_v56, 5  ;;  %v5281_v54 = vld [vmem:[%s6557_s27 + $0x60] sm:$0xf] }
  0x27   : > { %v2306_v5 = vrot.slane %v2304_v57, 5  ;;  %v2283_v9 = vsel %vm6614_vm4, %v2278_v60, %v2282_v40  ;;  %v2288_v6 = vrot.slane %v2287_v61, 4  ;;  %v2314_v14 = vshll.u32 %v6672_v50, 16  ;;  %v6715_v56 = vld [vmem:[%s6557_s27 + $0x64] sm:$0xf] }
  0x28   : > { %v2310_v11 = vrot.slane %v2308_v62, 4  ;;  %5915 = vmatprep.mubr.msk.bf16.mxu0 %vm343_vm1, %v5311_v0  ;;  %v2301_v17 = vor.u32 %v2300_v2, %v2297_v1  ;;  %v2319_v18 = vshrl.u32 %v5275_v58, 16  ;;  %v2322_v19 = vshll.u32 %v5275_v58, 16  ;;  %v6721_v2 = vld [vmem:[%s6557_s27 + $0x68] sm:$0x1] }
  0x29   : > { %v2328_v20 = vshll.u32 %v6685_v63, 16  ;;  %v2293_v21 = vsel %vm6614_vm4, %v2288_v6, %v2292_v48  ;;  %v2316_v24 = vrot.slane %v2314_v14, 5  ;;  %v2332_v26 = vshrl.u32 %v6685_v63, 16 }
  0x2a   : > { %v2311_v23 = vor.u32 %v2310_v11, %v2306_v5  ;;  %v5312_v29 = vcombine.low %v2283_v9, %v2293_v21  ;;  %v2302_v30 = vrot.slane %v2301_v17, 4  ;;  %v2321_v31 = vrot.slane %v2319_v18, 4  ;;  %v5342_v21 = vld [vmem:[%s6557_s27 + $0x18] sm:$0xe] }
  0x2b   : > { %v2324_v33 = vrot.slane %v2322_v19, 5  ;;  %v2330_v36 = vrot.slane %v2328_v20, 5  ;;  %v2334_v39 = vrot.slane %v2332_v26, 4  ;;  %v2338_v40 = vshll.u32 %v6688_v7, 16  ;;  %v5341_v20 = vld [vmem:[%s6557_s27 + $0xc] sm:$0xe] }
  0x2c   : > { %5788 = vmatmul.mubr.msk.bf16.gmra.mrb[12].mxu1 %vm343_vm1, %v6411_v52  ;;  %v2312_v35 = vrot.slane %v2311_v23, 4  ;;  %5916 = vmatmul.mubr.msk.bf16.gmra.mrb[4].mxu0 %vm343_vm1, %v5312_v29  ;;  %v2307_v47 = vsel %vm6614_vm4, %v2302_v30, %v2306_v5  ;;  %v2343_v51 = vshrl.u32 %v5278_v28, 16  ;;  %v2346_v52 = vshll.u32 %v5278_v28, 16  ;;  %v6414_v5 = vld [vmem:[%s6557_s27 + $0x78] sm:$0xff]  }
  0x2d   : > { %5791 = vmatprep.mubr.msk.bf16.mxu1 %vm343_vm1, %v6412_v8  ;;  %v2325_v48 = vor.u32 %v2324_v33, %v2321_v31  ;;  %v2335_v58 = vor.u32 %v2334_v39, %v2330_v36  ;;  %v2340_v12 = vrot.slane %v2338_v40, 5  ;;  %v2352_v60 = vshll.u32 %v6703_v34, 16 }
  0x2e   : > { %v2317_v57 = vsel %vm6614_vm4, %v2312_v35, %v2316_v24  ;;  %v2345_v0 = vrot.slane %v2343_v51, 4  ;;  %v2348_v1 = vrot.slane %v2346_v52, 5  ;;  %v2356_v6 = vshrl.u32 %v6703_v34, 16 }
  0x2f   : > { %v5313_v61 = vcombine.low %v2307_v47, %v2317_v57  ;;  %v2326_v62 = vrot.slane %v2325_v48, 4  ;;  %v2336_v8 = vrot.slane %v2335_v58, 4  ;;  %v2354_v9 = vrot.slane %v2352_v60, 5  ;;  %v6416_v57 = vld [vmem:[%s6557_s27 + $0x90] sm:$0xff]   ;;  %v5343_v58 = vld [vmem:[%s6557_s27 + $0x24] sm:$0xe] }
  0x30   : > { %v2362_v11 = vshll.u32 %v6708_v45, 16  ;;  %v2349_v17 = vor.u32 %v2348_v1, %v2345_v0  ;;  %v2367_v18 = vshrl.u32 %v5281_v54, 16  ;;  %v2370_v19 = vshll.u32 %v5281_v54, 16  ;;  %v5344_v0 = vld [vmem:[%s6557_s27 + $0x30] sm:$0xe] }
  0x31   : > { %5919 = vmatprep.mubr.msk.bf16.mxu0 %vm343_vm1, %v5313_v61  ;;  %v2331_v14 = vsel %vm6614_vm4, %v2326_v62, %v2330_v36  ;;  %v2341_v23 = vsel %vm6614_vm4, %v2336_v8, %v2340_v12  ;;  %v2358_v24 = vrot.slane %v2356_v6, 4  ;;  %v2376_v28 = vshll.u32 %v6715_v56, 16 }
  0x32   : > { %v2364_v26 = vrot.slane %v2362_v11, 5  ;;  %v5314_v29 = vcombine.low %v2331_v14, %v2341_v23  ;;  %v2350_v30 = vrot.slane %v2349_v17, 4  ;;  %v2369_v31 = vrot.slane %v2367_v18, 4  ;;  %v5345_v14 = vld [vmem:[%s6557_s27 + $0x3c] sm:$0xe] }
  0x33   : > { %v2372_v33 = vrot.slane %v2370_v19, 5  ;;  %v2359_v35 = vor.u32 %v2358_v24, %v2354_v9  ;;  %v2378_v36 = vrot.slane %v2376_v28, 5  ;;  %v2380_v39 = vshrl.u32 %v6715_v56, 16  ;;  %v589_v24 = vld [vmem:[%s6557_s27] sm:$0xf] }
  0x34   : > { %5792 = vmatmul.mubr.msk.bf16.gmra.mrb[16].mxu1 %vm343_vm1, %v6413_v44  ;;  %v2386_v40 = vshll.u32 %v6721_v2, 16  ;;  %v6415_v44 = vld [vmem:[%s6557_s27 + $0x84] sm:$0xff]   ;;  %5920 = vmatmul.mubr.msk.bf16.gmra.mrb[8].mxu0 %vm343_vm1, %v5314_v29  ;;  %v2355_v48 = vsel %vm6614_vm4, %v2350_v30, %v2354_v9  ;;  %v5357_v52 = vrot.slane %v5341_v20, 9  ;;  %v2944_v54 = vrot.slane %v2942_v43, 4 }
  0x35   : > { %5795 = vmatprep.mubr.msk.bf16.mxu1 %vm343_vm1, %v6414_v5  ;;  %v2373_v51 = vor.u32 %v2372_v33, %v2369_v31  ;;  %v2360_v12 = vrot.slane %v2359_v35, 4  ;;  %v2382_v60 = vrot.slane %v2380_v39, 4  ;;  %v5358_v62 = vrot.slane %v5342_v21, 9  ;;  %v5346_v20 = vld [vmem:[%s6557_s27 + $0x48] sm:$0xe]  ;;  %v6417_v31 = vld [vmem:[%s6557_s27 + $0x9c] sm:$0xff]  }
  0x36   : > { %v2388_v61 = vrot.slane %v2386_v40, 5  ;;  %v6758_v5 = vsel %vm6741_vm7, %v6663_v37, %v2952_v38  ;;  %v5359_v8 = vrot.slane %v5343_v58, 9  ;;  %v2943_v11 = vsel %vm6741_vm7, %v5357_v52, %v2942_v43  ;;  %v590_v30 = vld [vmem:[%s6557_s27 + $0x4] sm:$0xf]  ;;  %v6418_v35 = vld [vmem:[%s6557_s27 + $0xa8] sm:$0xff]  }
  0x37   : > { %v2374_v1 = vrot.slane %v2373_v51, 4  ;;  %v2365_v9 = vsel %vm6614_vm4, %v2360_v12, %v2364_v26  ;;  %v2383_v6 = vor.u32 %v2382_v60, %v2378_v36  ;;  %v2946_v32 = vsel %vm6741_vm7, %v2944_v54, %v2945_v49  ;;  %v592_v52 = vld [vmem:[%s6557_s27 + $0xc] sm:$0xf]  ;;  %v6828_v60 = vld [vmem:[%s6557_s27 + $0x10] sm:$0xf] }
  0x38   : > { %v5315_v17 = vcombine.low %v2355_v48, %v2365_v9  ;;  %v6777_v38 = vsel %vm6741_vm7, %v5358_v62, %v2949_v53  ;;  %v2956_v15 = vrot.slane %v6629_v55, 5  ;;  %v2959_v16 = vrot.slane %v6636_v59, 5  ;;  %v6819_v48 = vld [vmem:[%s6557_s27 + $0x8] sm:$0x1] }
  0x39   : > { %v2379_v37 = vsel %vm6614_vm4, %v2374_v1, %v2378_v36  ;;  %v2384_v43 = vrot.slane %v2383_v6, 4  ;;  %v5360_v49 = vrot.slane %v5344_v0, 9  ;;  %v2963_v18 = vrot.slane %v6642_v3, 5 }
  0x3a   : > { %5923 = vmatprep.mubr.msk.bf16.mxu0 %vm343_vm1, %v5315_v17  ;;  %v5374_v19 = vcombine.low %v2943_v11, %v2946_v32  ;;  %v2958_v25 = vrot.slane %v2956_v15, 4  ;;  %v2966_v53 = vrot.slane %v6647_v10, 5  ;;  %v5361_v55 = vrot.slane %v5345_v14, 9  ;;  %v6839_v11 = vld [vmem:[%s6557_s27 + $0x14] sm:$0x1] }
  0x3b   : > { %v2389_v21 = vsel %vm6614_vm4, %v2384_v43, %v2388_v61  ;;  %v6791_v59 = vsel %vm6741_vm7, %v5359_v8, %v2956_v15  ;;  %v2965_v3 = vrot.slane %v2963_v18, 4  ;;  %v2970_v23 = vrot.slane %v6668_v41, 5  ;;  %v5347_v43 = vld [vmem:[%s6557_s27 + $0x54] sm:$0xe] }
  0x3c   : > { %5796 = vmatmul.mubr.msk.bf16.gmra.mrb[20].mxu1 %vm343_vm1, %v6415_v44  ;;  %v5316_v26 = vcombine.low %v2379_v37, %v2389_v21  ;;  %v5375_v28 = vcombine.low %v6777_v38, %v6758_v5  ;;  %v2960_v10 = vsel %vm6741_vm7, %v2958_v25, %v2959_v16  ;;  %v2973_v29 = vrot.slane %v6672_v50, 5  ;;  %v6419_v25 = vld [vmem:[%s6557_s27 + $0xb4] sm:$0xff]  }
  0x3d   : > { %5799 = vmatprep.mubr.msk.bf16.mxu1 %vm343_vm1, %v6416_v57  ;;  %v6804_v33 = vsel %vm6741_vm7, %v5360_v49, %v2963_v18  ;;  %v6808_v41 = vsel %vm6741_vm7, %v2965_v3, %v2966_v53  ;;  %v2972_v36 = vrot.slane %v2970_v23, 4  ;;  %v5362_v39 = vrot.slane %v5346_v20, 9 }
  0x3e   : > { %5924 = vmatmul.mubr.msk.bf16.gmra.mrb[12].mxu0 %vm343_vm1, %v5316_v26  ;;  %v5376_v40 = vcombine.low %v6791_v59, %v2960_v10  ;;  %v6815_v50 = vsel %vm6741_vm7, %v5361_v55, %v2970_v23  ;;  %v2977_v44 = vrot.slane %v6685_v63, 5  ;;  %v641_v51 = vshrl.u32 %v589_v24, 16  ;;  %v5348_v59 = vld [vmem:[%s6557_s27 + $0x60] sm:$0xe]  ;;  %v595_v10 = vld [vmem:[%s6557_s27 + $0x18] sm:$0xf] }
  0x3f   : > { %5945 = vmatprep.mubr.msk.bf16.mxu0 %vm343_vm1, %v5374_v19  ;;  %v6825_v54 = vsel %vm6741_vm7, %v2972_v36, %v2973_v29  ;;  %v644_v57 = vshll.u32 %v589_v24, 16  ;;  %v650_v58 = vshll.u32 %v590_v30, 16  ;;  %v654_v12 = vshrl.u32 %v590_v30, 16 }
  0x40   : > { %v5377_v61 = vcombine.low %v6804_v33, %v6808_v41  ;;  %v2979_v63 = vrot.slane %v2977_v44, 4  ;;  %v2980_v62 = vrot.slane %v6688_v7, 5  ;;  %v643_v0 = vrot.slane %v641_v51, 4  ;;  %v5285_v41 = vld [vmem:[%s6557_s27 + $0x70] sm:$0xf] }
  0x41   : > { %v646_v1 = vrot.slane %v644_v57, 5  ;;  %v652_v5 = vrot.slane %v650_v58, 5  ;;  %v656_v8 = vrot.slane %v654_v12, 4  ;;  %v660_v9 = vshll.u32 %v6819_v48, 16  ;;  %v6878_v58 = vld [vmem:[%s6557_s27 + $0x20] sm:$0x1] }
  0x42   : > { %v5378_v6 = vcombine.low %v6815_v50, %v6825_v54  ;;  %v665_v32 = vshrl.u32 %v592_v52, 16  ;;  %v668_v14 = vshll.u32 %v592_v52, 16  ;;  %v674_v7 = vshll.u32 %v6828_v60, 16 }
  0x43   : > { %v6844_v17 = vsel %vm6741_vm7, %v5362_v39, %v2977_v44  ;;  %v647_v37 = vor.u32 %v646_v1, %v643_v0  ;;  %v657_v38 = vor.u32 %v656_v8, %v652_v5  ;;  %v662_v15 = vrot.slane %v660_v9, 5  ;;  %v598_v1 = vld [vmem:[%s6557_s27 + $0x24] sm:$0xf] }
  0x44   : > { %5800 = vmatmul.mubr.msk.bf16.gmra.mrb[24].mxu1 %vm343_vm1, %v6417_v31  ;;  %v667_v16 = vrot.slane %v665_v32, 4  ;;  %v670_v49 = vrot.slane %v668_v14, 5  ;;  %v676_v18 = vrot.slane %v674_v7, 5  ;;  %v678_v19 = vshrl.u32 %v6828_v60, 16  ;;  %v6898_v14 = vld [vmem:[%s6557_s27 + $0x28] sm:$0xf] }
  0x45   : > { %5803 = vmatprep.mubr.msk.bf16.mxu1 %vm343_vm1, %v6418_v35  ;;  %v6851_v53 = vsel %vm6741_vm7, %v2979_v63, %v2980_v62  ;;  %v648_v55 = vrot.slane %v647_v37, 4  ;;  %v658_v20 = vrot.slane %v657_v38, 4  ;;  %v684_v21 = vshll.u32 %v6839_v11, 16  ;;  %v6866_v35 = vld [vmem:[%s6557_s27 + $0x1c] sm:$0xf] }
  0x46   : > { %5946 = vmatmul.mubr.msk.bf16.vlgmr.msra.gmra.mrb[0].mxu0 %vm343_vm1, %v5375_v28  ;;  %v671_v3 = vor.u32 %v670_v49, %v667_v16  ;;  %v680_v23 = vrot.slane %v678_v19, 4  ;;  %v5363_v24 = vrot.slane %v5347_v43, 9  ;;  %v2984_v26 = vrot.slane %v6703_v34, 5  ;;  %v5349_v19 = vld [vmem:[%s6557_s27 + $0x6c] sm:$0xe] }
  0x47   : > { %5978 = vmatpush3.bf16.msra.mxu0 %v6578_v13  ;;  %5949 = vmatprep.mubr.msk.bf16.mxu0 %vm343_vm1, %v5376_v40  ;;  %v653_v29 = vsel %vm6614_vm4, %v648_v55, %v652_v5  ;;  %v663_v30 = vsel %vm6614_vm4, %v658_v20, %v662_v15  ;;  %v686_v31 = vrot.slane %v684_v21, 5  ;;  %v2987_v28 = vrot.slane %v6708_v45, 5  ;;  %v6903_v15 = vld [vmem:[%s6557_s27 + $0x2c] sm:$0x1] }
  0x48   : > { %v5114_v36 = vcombine.low %v653_v29, %v663_v30  ;;  %v672_v39 = vrot.slane %v671_v3, 4  ;;  %v681_v34 = vor.u32 %v680_v23, %v676_v18  ;;  %v5364_v44 = vrot.slane %v5348_v59, 9  ;;  %6377 = vmatprep.subr.msk.bf16.mxu0 %vm392_vm0, %v6595_v22  ;;  %v5286_v23 = vld [vmem:[%s6557_s27 + $0x74] sm:$0x1] }
  0x49   : > { %v5379_v13 = vcombine.low %v6844_v17, %v6851_v53  ;;  %v2986_v40 = vrot.slane %v2984_v26, 4  ;;  %v2991_v51 = vrot.slane %v6715_v56, 5  ;;  %v689_v52 = vshrl.u32 %v595_v10, 16 }
  0x4a   : > { %v677_v45 = vsel %vm6614_vm4, %v672_v39, %v676_v18  ;;  %v682_v57 = vrot.slane %v681_v34, 4  ;;  %v692_v22 = vshll.u32 %v595_v10, 16  ;;  %v698_v12 = vshll.u32 %v6866_v35, 16 }
  0x4b   : > { %v6883_v63 = vsel %vm6741_vm7, %v5363_v24, %v2984_v26  ;;  %v6887_v56 = vsel %vm6741_vm7, %v2986_v40, %v2987_v28  ;;  %v2994_v62 = vrot.slane %v6721_v2, 5  ;;  %v691_v0 = vrot.slane %v689_v52, 4 }
  0x4c   : > { %5804 = vmatmul.mubr.msk.bf16.gmra.mrb[28].mxu1 %vm343_vm1, %v6419_v25  ;;  %v687_v5 = vsel %vm6614_vm4, %v682_v57, %v686_v31  ;;  %v6895_v8 = vsel %vm6741_vm7, %v5364_v44, %v2991_v51  ;;  %v2993_v9 = vrot.slane %v2991_v51, 4  ;;  %v694_v32 = vrot.slane %v692_v22, 5  ;;  %v5288_v31 = vld [vmem:[%s6557_s27 + $0x7c] sm:$0xf] }
  0x4d   : > { %5809 = vmatprep.mubr.msk.bf16.mxu1 %vm343_vm1, %v5114_v36  ;;  %v5115_v7 = vcombine.low %v677_v45, %v687_v5  ;;  %v700_v37 = vrot.slane %v698_v12, 5  ;;  %v702_v38 = vshrl.u32 %v6866_v35, 16  ;;  %v708_v2 = vshll.u32 %v6878_v58, 16  ;;  %v5350_v45 = vld [vmem:[%s6557_s27 + $0x78] sm:$0xe] }
  0x4e   : > { %5950 = vmatmul.mubr.msk.bf16.gmra.mrb[4].mxu0 %vm343_vm1, %v5377_v61  ;;  %v5380_v43 = vcombine.low %v6883_v63, %v6887_v56  ;;  %v695_v16 = vor.u32 %v694_v32, %v691_v0  ;;  %v713_v49 = vshrl.u32 %v598_v1, 16  ;;  %v716_v18 = vshll.u32 %v598_v1, 16  ;;  %v6934_v12 = vld [vmem:[%s6557_s27 + $0x80] sm:$0x1]  ;;  %v601_v5 = vld [vmem:[%s6557_s27 + $0x30] sm:$0xf] }
  0x4f   : > { %5953 = vmatprep.mubr.msk.bf16.mxu0 %vm343_vm1, %v5378_v6  ;;  %v704_v25 = vrot.slane %v702_v38, 4  ;;  %v710_v55 = vrot.slane %v708_v2, 5  ;;  %v722_v20 = vshll.u32 %v6898_v14, 16  ;;  %v726_v33 = vshrl.u32 %v6898_v14, 16 }
  0x50   : > { %v696_v61 = vrot.slane %v695_v16, 4  ;;  %v715_v21 = vrot.slane %v713_v49, 4  ;;  %v718_v59 = vrot.slane %v716_v18, 5  ;;  %v732_v3 = vshll.u32 %v6903_v15, 16 }
  0x51   : > { %v705_v24 = vor.u32 %v704_v25, %v700_v37  ;;  %v724_v50 = vrot.slane %v722_v20, 5  ;;  %v728_v54 = vrot.slane %v726_v33, 4  ;;  %v5365_v6 = vrot.slane %v5349_v19, 9  ;;  %v604_v19 = vld [vmem:[%s6557_s27 + $0x3c] sm:$0xf] }
  0x52   : > { %v701_v26 = vsel %vm6614_vm4, %v696_v61, %v700_v37  ;;  %v719_v10 = vor.u32 %v718_v59, %v715_v21  ;;  %v734_v29 = vrot.slane %v732_v3, 5  ;;  %v2998_v30 = vrot.slane %v5285_v41, 5  ;;  %v6974_v41 = vld [vmem:[%s6557_s27 + $0x40] sm:$0xf] }
  0x53   : > { %v706_v28 = vrot.slane %v705_v24, 4  ;;  %v729_v36 = vor.u32 %v728_v54, %v724_v50  ;;  %v3001_v39 = vrot.slane %v5286_v23, 5  ;;  %v2424_v34 = vshll.u32 %v5288_v31, 16  ;;  %v6977_v23 = vld [vmem:[%s6557_s27 + $0x44] sm:$0x1] }
  0x54   : > { %5810 = vmatmul.mubr.msk.bf16.vlgmr.msra.gmra.mrb[0].mxu1 %vm343_vm1, %v5115_v7  ;;  %v2995_v44 = vsel %vm6741_vm7, %v2993_v9, %v2994_v62  ;;  %v720_v40 = vrot.slane %v719_v10, 4  ;;  %v3000_v51 = vrot.slane %v2998_v30, 4  ;;  %v2428_v52 = vshrl.u32 %v5288_v31, 16  ;;  %v6950_v9 = vld [vmem:[%s6557_s27 + $0x34] sm:$0xf] }
  0x55   : > { %5842 = vmatpush3.bf16.msra.mxu1 %v6603_v27  ;;  %v711_v27 = vsel %vm6614_vm4, %v706_v28, %v710_v55  ;;  %v730_v57 = vrot.slane %v729_v36, 4  ;;  %v2999_v22 = vsel %vm6741_vm7, %v5365_v6, %v2998_v30  ;;  %v6936_v63 = vrot.slane %v2424_v34, 5  ;;  %v6958_v7 = vld [vmem:[%s6557_s27 + $0x38] sm:$0x1]  ;;  %v5291_v28 = vld [vmem:[%s6557_s27 + $0x88] sm:$0xf] }
  0x56   : > { %5954 = vmatmul.mubr.msk.bf16.gmra.mrb[8].mxu0 %vm343_vm1, %v5379_v13  ;;  %v5116_v56 = vcombine.low %v701_v26, %v711_v27  ;;  %v725_v62 = vsel %vm6614_vm4, %v720_v40, %v724_v50  ;;  %v3002_v0 = vsel %vm6741_vm7, %v3000_v51, %v3001_v39  ;;  %v6946_v1 = vrot.slane %v2428_v52, 4  ;;  %v5351_v26 = vld [vmem:[%s6557_s27 + $0x84] sm:$0xe]  ;;  %v5292_v36 = vld [vmem:[%s6557_s27 + $0x8c] sm:$0x1] }
  0x57   : > { %5957 = vmatprep.mubr.msk.bf16.mxu0 %vm343_vm1, %v5380_v43  ;;  %v5381_v32 = vcombine.low %v6895_v8, %v2995_v44  ;;  %v735_v17 = vsel %vm6614_vm4, %v730_v57, %v734_v29  ;;  %v5366_v13 = vrot.slane %v5350_v45, 9  ;;  %v5382_v38 = vcombine.low %v2999_v22, %v3002_v0  ;;  %v5294_v51 = vld [vmem:[%s6557_s27 + $0x94] sm:$0xf]  ;;  %v5352_v52 = vld [vmem:[%s6557_s27 + $0x90] sm:$0xe] }
  0x58   : > { %5813 = vmatprep.mubr.msk.bf16.mxu1 %vm343_vm1, %v5116_v56  ;;  %v5117_v37 = vcombine.low %v725_v62, %v735_v17  ;;  %v3005_v2 = vrot.slane %v5288_v31, 5  ;;  %v3008_v16 = vrot.slane %v6934_v12, 5  ;;  %v737_v43 = vshrl.u32 %v601_v5, 16  ;;  %v5295_v56 = vld [vmem:[%s6557_s27 + $0x98] sm:$0x1] }
  0x59   : > { %v740_v49 = vshll.u32 %v601_v5, 16  ;;  %v746_v8 = vshll.u32 %v6950_v9, 16  ;;  %v750_v18 = vshrl.u32 %v6950_v9, 16  ;;  %v756_v33 = vshll.u32 %v6958_v7, 16  ;;  %v607_v17 = vld [vmem:[%s6557_s27 + $0x48] sm:$0xf] }
  0x5a   : > { %v6970_v55 = vsel %vm6741_vm7, %v5366_v13, %v3005_v2  ;;  %v3007_v20 = vrot.slane %v3005_v2, 4  ;;  %v739_v61 = vrot.slane %v737_v43, 4  ;;  %v761_v54 = vshrl.u32 %v604_v19, 16 }
  0x5b   : > { %v742_v21 = vrot.slane %v740_v49, 5  ;;  %v748_v59 = vrot.slane %v746_v8, 5  ;;  %v752_v3 = vrot.slane %v750_v18, 4  ;;  %v758_v50 = vrot.slane %v756_v33, 5 }
  0x5c   : > { %5814 = vmatmul.mubr.msk.bf16.gmra.mrb[4].mxu1 %vm343_vm1, %v5117_v37  ;;  %v3009_v24 = vsel %vm6741_vm7, %v3007_v20, %v3008_v16  ;;  %v764_v6 = vshll.u32 %v604_v19, 16  ;;  %v770_v31 = vshll.u32 %v6974_v41, 16  ;;  %v763_v39 = vrot.slane %v761_v54, 4  ;;  %v6999_v16 = vld [vmem:[%s6557_s27 + $0x4c] sm:$0xf] }
  0x5d   : > { %v5383_v10 = vcombine.low %v6970_v55, %v3009_v24  ;;  %v743_v29 = vor.u32 %v742_v21, %v739_v61  ;;  %v753_v30 = vor.u32 %v752_v3, %v748_v59  ;;  %v774_v44 = vshrl.u32 %v6974_v41, 16  ;;  %v7004_v19 = vld [vmem:[%s6557_s27 + $0x50] sm:$0x1]  ;;  %v610_v21 = vld [vmem:[%s6557_s27 + $0x54] sm:$0xf] }
  0x5e   : > { %5958 = vmatmul.mubr.msk.bf16.gmra.mrb[12].mxu0 %vm343_vm1, %v5381_v32  ;;  %v766_v34 = vrot.slane %v764_v6, 5  ;;  %v780_v40 = vshll.u32 %v6977_v23, 16  ;;  %v772_v57 = vrot.slane %v770_v31, 5  ;;  %v5367_v22 = vrot.slane %v5351_v26, 9 }
  0x5f   : > { %5961 = vmatprep.mubr.msk.bf16.mxu0 %vm343_vm1, %v5382_v38  ;;  %v744_v45 = vrot.slane %v743_v29, 4  ;;  %v754_v27 = vrot.slane %v753_v30, 4  ;;  %v776_v0 = vrot.slane %v774_v44, 4  ;;  %v3012_v32 = vrot.slane %v5291_v28, 5 }
  0x60   : > { %v767_v62 = vor.u32 %v766_v34, %v763_v39  ;;  %v782_v5 = vrot.slane %v780_v40, 5  ;;  %v3015_v2 = vrot.slane %v5292_v36, 5  ;;  %v5368_v38 = vrot.slane %v5352_v52, 9  ;;  %v7019_v39 = vld [vmem:[%s6557_s27 + $0x58] sm:$0xf] }
  0x61   : > { %v749_v13 = vsel %vm6614_vm4, %v744_v45, %v748_v59  ;;  %v759_v37 = vsel %vm6614_vm4, %v754_v27, %v758_v50  ;;  %v777_v8 = vor.u32 %v776_v0, %v772_v57  ;;  %v3013_v18 = vsel %vm6741_vm7, %v5367_v22, %v3012_v32  ;;  %v5297_v52 = vld [vmem:[%s6557_s27 + $0xa0] sm:$0xf] }
  0x62   : > { %v5118_v43 = vcombine.low %v749_v13, %v759_v37  ;;  %v768_v49 = vrot.slane %v767_v62, 4  ;;  %v3014_v55 = vrot.slane %v3012_v32, 4  ;;  %v3019_v20 = vrot.slane %v5294_v51, 5  ;;  %v5353_v62 = vld [vmem:[%s6557_s27 + $0x9c] sm:$0xe] }
  0x63   : > { %v3022_v33 = vrot.slane %v5295_v56, 5  ;;  %v785_v61 = vshrl.u32 %v607_v17, 16  ;;  %v778_v3 = vrot.slane %v777_v8, 4  ;;  %v788_v24 = vshll.u32 %v607_v17, 16  ;;  %v5298_v56 = vld [vmem:[%s6557_s27 + $0xa4] sm:$0x1] }
  0x64   : > { %5817 = vmatprep.mubr.msk.bf16.mxu1 %vm343_vm1, %v5118_v43  ;;  %v773_v59 = vsel %vm6614_vm4, %v768_v49, %v772_v57  ;;  %v794_v50 = vshll.u32 %v6999_v16, 16  ;;  %v3016_v54 = vsel %vm6741_vm7, %v3014_v55, %v3015_v2  ;;  %v3020_v6 = vsel %vm6741_vm7, %v5368_v38, %v3019_v20  ;;  %v5300_v13 = vld [vmem:[%s6557_s27 + $0xac] sm:$0xf]  ;;  %v5354_v37 = vld [vmem:[%s6557_s27 + $0xa8] sm:$0xe] }
  0x65   : > { %v3021_v26 = vrot.slane %v3019_v20, 4  ;;  %v787_v29 = vrot.slane %v785_v61, 4  ;;  %v783_v30 = vsel %vm6614_vm4, %v778_v3, %v782_v5  ;;  %v5384_v31 = vcombine.low %v3013_v18, %v3016_v54  ;;  %v5301_v8 = vld [vmem:[%s6557_s27 + $0xb0] sm:$0x1]  ;;  %v613_v18 = vld [vmem:[%s6557_s27 + $0x60] sm:$0xf] }
  0x66   : > { %5962 = vmatmul.mubr.msk.bf16.gmra.mrb[16].mxu0 %vm343_vm1, %v5383_v10  ;;  %v790_v28 = vrot.slane %v788_v24, 5  ;;  %v796_v36 = vrot.slane %v794_v50, 5  ;;  %v5119_v34 = vcombine.low %v773_v59, %v783_v30  ;;  %v798_v40 = vshrl.u32 %v6999_v16, 16  ;;  %v7026_v10 = vld [vmem:[%s6557_s27 + $0x5c] sm:$0x1] }
  0x67   : > { %v3023_v44 = vsel %vm6741_vm7, %v3021_v26, %v3022_v33  ;;  %v804_v51 = vshll.u32 %v7004_v19, 16  ;;  %5965 = vmatprep.mubr.msk.bf16.mxu0 %vm343_vm1, %v5384_v31  ;;  %v809_v57 = vshrl.u32 %v610_v21, 16  ;;  %v812_v22 = vshll.u32 %v610_v21, 16 }
  0x68   : > { %v5385_v45 = vcombine.low %v3020_v6, %v3023_v44  ;;  %v791_v27 = vor.u32 %v790_v28, %v787_v29  ;;  %5818 = vmatmul.mubr.msk.bf16.gmra.mrb[8].mxu1 %vm343_vm1, %v5119_v34  ;;  %v800_v0 = vrot.slane %v798_v40, 4  ;;  %v818_v32 = vshll.u32 %v7019_v39, 16  ;;  %v7048_v40 = vld [vmem:[%s6557_s27 + $0x64] sm:$0xf] }
  0x69   : > { %v806_v5 = vrot.slane %v804_v51, 5  ;;  %v822_v17 = vshrl.u32 %v7019_v39, 16  ;;  %v811_v38 = vrot.slane %v809_v57, 4  ;;  %v814_v43 = vrot.slane %v812_v22, 5  ;;  %v7057_v22 = vld [vmem:[%s6557_s27 + $0x68] sm:$0x1] }
  0x6a   : > { %v792_v2 = vrot.slane %v791_v27, 4  ;;  %v828_v49 = vshll.u32 %v7026_v10, 16  ;;  %v801_v55 = vor.u32 %v800_v0, %v796_v36  ;;  %v820_v20 = vrot.slane %v818_v32, 5 }
  0x6b   : > { %v824_v33 = vrot.slane %v822_v17, 4  ;;  %v5369_v61 = vrot.slane %v5353_v62, 9  ;;  %v815_v59 = vor.u32 %v814_v43, %v811_v38  ;;  %v3026_v24 = vrot.slane %v5297_v52, 5  ;;  %v7061_v62 = vld [vmem:[%s6557_s27 + $0x70] sm:$0xf] }
  0x6c   : > { %v797_v21 = vsel %vm6614_vm4, %v792_v2, %v796_v36  ;;  %v830_v3 = vrot.slane %v828_v49, 5  ;;  %v802_v50 = vrot.slane %v801_v55, 4  ;;  %v3029_v6 = vrot.slane %v5298_v56, 5  ;;  %v616_v56 = vld [vmem:[%s6557_s27 + $0x6c] sm:$0xf] }
  0x6d   : > { %v825_v54 = vor.u32 %v824_v33, %v820_v20  ;;  %v5370_v26 = vrot.slane %v5354_v37, 9  ;;  %v816_v29 = vrot.slane %v815_v59, 4  ;;  %v3027_v30 = vsel %vm6741_vm7, %v5369_v61, %v3026_v24  ;;  %v5303_v49 = vld [vmem:[%s6557_s27 + $0xb8] sm:$0xf] }
  0x6e   : > { %5966 = vmatmul.mubr.msk.bf16.gmra.mrb[20].mxu0 %vm343_vm1, %v5385_v45  ;;  %v3028_v31 = vrot.slane %v3026_v24, 4  ;;  %v3033_v28 = vrot.slane %v5300_v13, 5  ;;  %v807_v36 = vsel %vm6614_vm4, %v802_v50, %v806_v5  ;;  %v3036_v44 = vrot.slane %v5301_v8, 5  ;;  %v7066_v13 = vld [vmem:[%s6557_s27 + $0x74] sm:$0x1] }
  0x6f   : > { %v826_v34 = vrot.slane %v825_v54, 4  ;;  %v833_v51 = vshrl.u32 %v613_v18, 16  ;;  %v5120_v52 = vcombine.low %v797_v21, %v807_v36  ;;  %v821_v45 = vsel %vm6614_vm4, %v816_v29, %v820_v20  ;;  %v5355_v24 = vld [vmem:[%s6557_s27 + $0xb4] sm:$0xe]  ;;  %v5356_v29 = vld [vmem:[%s6557_s27 + $0xc0] sm:$0xe] }
  0x70   : > { %v3030_v27 = vsel %vm6741_vm7, %v3028_v31, %v3029_v6  ;;  %v3034_v57 = vsel %vm6741_vm7, %v5370_v26, %v3033_v28  ;;  %v3035_v32 = vrot.slane %v3033_v28, 4  ;;  %v836_v2 = vshll.u32 %v613_v18, 16 }
  0x71   : > { %v831_v0 = vsel %vm6614_vm4, %v826_v34, %v830_v3  ;;  %v5386_v5 = vcombine.low %v3027_v30, %v3030_v27  ;;  %v835_v17 = vrot.slane %v833_v51, 4  ;;  %5821 = vmatprep.mubr.msk.bf16.mxu1 %vm343_vm1, %v5120_v52  ;;  %v842_v38 = vshll.u32 %v7048_v40, 16  ;;  %v5304_v3 = vld [vmem:[%s6557_s27 + $0xbc] sm:$0x1]  ;;  %v5306_v34 = vld [vmem:[%s6557_s27 + $0xc4] sm:$0xf] }
  0x72   : > { %v5121_v37 = vcombine.low %v821_v45, %v831_v0  ;;  %v846_v43 = vshrl.u32 %v7048_v40, 16  ;;  %v3037_v8 = vsel %vm6741_vm7, %v3035_v32, %v3036_v44  ;;  %v852_v55 = vshll.u32 %v7057_v22, 16  ;;  %v5307_v27 = vld [vmem:[%s6557_s27 + $0xc8] sm:$0x1] }
  0x73   : > { %5969 = vmatprep.mubr.msk.bf16.mxu0 %vm343_vm1, %v5386_v5  ;;  %v857_v20 = vshrl.u32 %v616_v56, 16  ;;  %v860_v33 = vshll.u32 %v616_v56, 16  ;;  %v5387_v61 = vcombine.low %v3034_v57, %v3037_v8  ;;  %v838_v18 = vrot.slane %v836_v2, 5  ;;  %v619_v57 = vld [vmem:[%s6557_s27 + $0x78] sm:$0xf] }
  0x74   : > { %5822 = vmatmul.mubr.msk.bf16.gmra.mrb[12].mxu1 %vm343_vm1, %v5121_v37  ;;  %v844_v21 = vrot.slane %v842_v38, 5  ;;  %v848_v59 = vrot.slane %v846_v43, 4  ;;  %v854_v50 = vrot.slane %v852_v55, 5  ;;  %v866_v26 = vshll.u32 %v7061_v62, 16  ;;  %v7092_v43 = vld [vmem:[%s8193_s1 + $0x6] sm:$0x3] }
  0x75   : > { %v859_v54 = vrot.slane %v857_v20, 4  ;;  %v862_v6 = vrot.slane %v860_v33, 5  ;;  %v839_v30 = vor.u32 %v838_v18, %v835_v17  ;;  %v870_v28 = vshrl.u32 %v7061_v62, 16  ;;  %v7099_v33 = vld [vmem:[%s6557_s27 + $0x7c] sm:$0xf]  ;;  %6372 = vmatprep.subr.msk.bf16.mxu1 %vm392_vm0, %v7092_v43 }
  0x76   : > { %5970 = vmatmul.mubr.msk.bf16.gmra.mrb[24].mxu0 %vm343_vm1, %v5387_v61  ;;  %v849_v31 = vor.u32 %v848_v59, %v844_v21  ;;  %v876_v36 = vshll.u32 %v7066_v13, 16  ;;  %v868_v51 = vrot.slane %v866_v26, 5  ;;  %v5371_v52 = vrot.slane %v5355_v24, 9  ;;  %v7102_v61 = vld [vmem:[%s6557_s27 + $0x80] sm:$0x1] }
  0x77   : > { %v863_v44 = vor.u32 %v862_v6, %v859_v54  ;;  %v3040_v45 = vrot.slane %v5303_v49, 5  ;;  %v840_v56 = vrot.slane %v839_v30, 4  ;;  %v872_v5 = vrot.slane %v870_v28, 4  ;;  %v622_v24 = vld [vmem:[%s6557_s27 + $0x84] sm:$0xf] }
  0x78   : > { %v850_v0 = vrot.slane %v849_v31, 4  ;;  %v878_v32 = vrot.slane %v876_v36, 5  ;;  %v3043_v38 = vrot.slane %v5304_v3, 5  ;;  %v5372_v20 = vrot.slane %v5356_v29, 9  ;;  %v7112_v29 = vld [vmem:[%s6557_s27 + $0x88] sm:$0xf] }
  0x79   : > { %v864_v37 = vrot.slane %v863_v44, 4  ;;  %v3041_v17 = vsel %vm6741_vm7, %v5371_v52, %v3040_v45  ;;  %v3042_v2 = vrot.slane %v3040_v45, 4  ;;  %v845_v49 = vsel %vm6614_vm4, %v840_v56, %v844_v21  ;;  %v7124_v45 = vld [vmem:[%s6557_s27 + $0x8c] sm:$0x1] }
  0x7a   : > { %v855_v8 = vsel %vm6614_vm4, %v850_v0, %v854_v50  ;;  %v873_v55 = vor.u32 %v872_v5, %v868_v51  ;;  %v3047_v3 = vrot.slane %v5306_v34, 5  ;;  %v3050_v6 = vrot.slane %v5307_v27, 5  ;;  %v6420_v27 = vld [vmem:[%s6557_s27 + $0x18] sm:$0xff]  }
  0x7b   : > { %v5122_v18 = vcombine.low %v845_v49, %v855_v8  ;;  %v869_v59 = vsel %vm6614_vm4, %v864_v37, %v868_v51  ;;  %v3044_v21 = vsel %vm6741_vm7, %v3042_v2, %v3043_v38  ;;  %v881_v26 = vshrl.u32 %v619_v57, 16  ;;  %v625_v37 = vld [vmem:[%s6557_s27 + $0x90] sm:$0xf]  ;;  %v7131_v49 = vld [vmem:[%s6557_s27 + $0x94] sm:$0xf] }
  0x7c   : > { %v874_v50 = vrot.slane %v873_v55, 4  ;;  %v5388_v54 = vcombine.low %v3041_v17, %v3044_v21  ;;  %v3048_v30 = vsel %vm6741_vm7, %v5372_v20, %v3047_v3  ;;  %v3049_v31 = vrot.slane %v3047_v3, 4 }
  0x7d   : > { %5825 = vmatprep.mubr.msk.bf16.mxu1 %vm343_vm1, %v5122_v18  ;;  %v884_v28 = vshll.u32 %v619_v57, 16  ;;  %v890_v36 = vshll.u32 %v7099_v33, 16  ;;  %v883_v44 = vrot.slane %v881_v26, 4  ;;  %v894_v51 = vshrl.u32 %v7099_v33, 16 }
  0x7e   : > { %v879_v34 = vsel %vm6614_vm4, %v874_v50, %v878_v32  ;;  %5973 = vmatprep.mubr.msk.bf16.mxu0 %vm343_vm1, %v5388_v54  ;;  %v900_v52 = vshll.u32 %v7102_v61, 16  ;;  %v3051_v57 = vsel %vm6741_vm7, %v3049_v31, %v3050_v6  ;;  %v905_v38 = vshrl.u32 %v622_v24, 16 }
  0x7f   : > { %v5123_v56 = vcombine.low %v869_v59, %v879_v34  ;;  %v886_v0 = vrot.slane %v884_v28, 5  ;;  %v892_v5 = vrot.slane %v890_v36, 5  ;;  %v5389_v32 = vcombine.low %v3048_v30, %v3051_v57  ;;  %v7137_v59 = vld [vmem:[%s6557_s27 + $0x98] sm:$0x1] }
  0x80   : > { %v896_v17 = vrot.slane %v894_v51, 4  ;;  %v902_v2 = vrot.slane %v900_v52, 5  ;;  %v908_v55 = vshll.u32 %v622_v24, 16  ;;  %v914_v20 = vshll.u32 %v7112_v29, 16  ;;  %v628_v24 = vld [vmem:[%s6557_s27 + $0x9c] sm:$0xf] }
  0x81   : > { %5826 = vmatmul.mubr.msk.bf16.gmra.mrb[16].mxu1 %vm343_vm1, %v5123_v56  ;;  %v887_v8 = vor.u32 %v886_v0, %v883_v44  ;;  %v918_v18 = vshrl.u32 %v7112_v29, 16  ;;  %5974 = vmatmul.mubr.msk.bf16.gmra.mrb[28].mxu0 %vm343_vm1, %v5389_v32  ;;  %v907_v3 = vrot.slane %v905_v38, 4  ;;  %v924_v50 = vshll.u32 %v7124_v45, 16  ;;  %v7144_v51 = vld [vmem:[%s6557_s27 + $0xa0] sm:$0xf]  ;;  %v6421_v32 = vld [vmem:[%s6557_s27 + $0x24] sm:$0xff]  }
  0x82   : > { %v897_v21 = vor.u32 %v896_v17, %v892_v5  ;;  %v929_v54 = vshrl.u32 %v625_v37, 16  ;;  %v910_v26 = vrot.slane %v908_v55, 5  ;;  %v916_v30 = vrot.slane %v914_v20, 5  ;;  %5979 = vmatprep.mubr.msk.bf16.mxu0 %vm343_vm1, %v6420_v27 }
  0x83   : > { %v888_v6 = vrot.slane %v887_v8, 4  ;;  %v920_v31 = vrot.slane %v918_v18, 4  ;;  %v926_v36 = vrot.slane %v924_v50, 5  ;;  %v932_v44 = vshll.u32 %v625_v37, 16  ;;  %v7155_v8 = vld [vmem:[%s6557_s27 + $0xa4] sm:$0x1] }
  0x84   : > { %v898_v28 = vrot.slane %v897_v21, 4  ;;  %v931_v34 = vrot.slane %v929_v54, 4  ;;  %v911_v56 = vor.u32 %v910_v26, %v907_v3  ;;  %v938_v0 = vshll.u32 %v7131_v49, 16  ;;  %v6422_v21 = vld [vmem:[%s6557_s27 + $0x30] sm:$0xff]   ;;  %v631_v26 = vld [vmem:[%s6557_s27 + $0xa8] sm:$0xf] }
  0x85   : > { %v893_v52 = vsel %vm6614_vm4, %v888_v6, %v892_v5  ;;  %v921_v57 = vor.u32 %v920_v31, %v916_v30  ;;  %v934_v17 = vrot.slane %v932_v44, 5  ;;  %v942_v38 = vshrl.u32 %v7131_v49, 16 }
  0x86   : > { %v903_v27 = vsel %vm6614_vm4, %v898_v28, %v902_v2  ;;  %v948_v37 = vshll.u32 %v7137_v59, 16  ;;  %v912_v20 = vrot.slane %v911_v56, 4  ;;  %v940_v18 = vrot.slane %v938_v0, 5 }
  0x87   : > { %v5124_v55 = vcombine.low %v893_v52, %v903_v27  ;;  %v922_v5 = vrot.slane %v921_v57, 4  ;;  %v935_v3 = vor.u32 %v934_v17, %v931_v34  ;;  %v944_v50 = vrot.slane %v942_v38, 4  ;;  %v7166_v52 = vld [vmem:[%s6557_s27 + $0xac] sm:$0xf]  ;;  %v7177_v38 = vld [vmem:[%s6557_s27 + $0xb0] sm:$0x1] }
  0x88   : > { %v950_v54 = vrot.slane %v948_v37, 5  ;;  %v953_v6 = vshrl.u32 %v628_v24, 16  ;;  %v917_v2 = vsel %vm6614_vm4, %v912_v20, %v916_v30  ;;  %v956_v28 = vshll.u32 %v628_v24, 16 }
  0x89   : > { %5829 = vmatprep.mubr.msk.bf16.mxu1 %vm343_vm1, %v5124_v55  ;;  %v927_v31 = vsel %vm6614_vm4, %v922_v5, %v926_v36  ;;  %v962_v44 = vshll.u32 %v7144_v51, 16  ;;  %5980 = vmatmul.mubr.msk.bf16.vlgmr.msra.gmra.mrb[0].mxu0 %vm343_vm1, %v6421_v32  ;;  %v936_v34 = vrot.slane %v935_v3, 4  ;;  %v945_v57 = vor.u32 %v944_v50, %v940_v18  ;;  %v634_v50 = vld [vmem:[%s6557_s27 + $0xb4] sm:$0xf] }
  0x8a   : > { %v5125_v56 = vcombine.low %v917_v2, %v927_v31  ;;  %v955_v0 = vrot.slane %v953_v6, 4  ;;  %6012 = vmatpush3.bf16.msra.mxu0 %v6621_v46  ;;  %v958_v27 = vrot.slane %v956_v28, 5  ;;  %v966_v36 = vshrl.u32 %v7144_v51, 16  ;;  %5983 = vmatprep.mubr.msk.bf16.mxu0 %vm343_vm1, %v6422_v21  ;;  %v6423_v6 = vld [vmem:[%s6557_s27 + $0x3c] sm:$0xff]   ;;  %v7186_v28 = vld [vmem:[%s6557_s27 + $0xb8] sm:$0xf] }
  0x8b   : > { %v964_v30 = vrot.slane %v962_v44, 5  ;;  %v972_v24 = vshll.u32 %v7155_v8, 16  ;;  %v941_v32 = vsel %vm6614_vm4, %v936_v34, %v940_v18  ;;  %v946_v17 = vrot.slane %v945_v57, 4  ;;  %v6424_v57 = vld [vmem:[%s6557_s27 + $0x48] sm:$0xff]  }
  0x8c   : > { %5830 = vmatmul.mubr.msk.bf16.gmra.mrb[20].mxu1 %vm343_vm1, %v5125_v56  ;;  %v977_v46 = vshrl.u32 %v631_v26, 16  ;;  %v980_v37 = vshll.u32 %v631_v26, 16  ;;  %v959_v55 = vor.u32 %v958_v27, %v955_v0  ;;  %v968_v20 = vrot.slane %v966_v36, 4 }
  0x8d   : > { %v974_v5 = vrot.slane %v972_v24, 5  ;;  %v986_v3 = vshll.u32 %v7166_v52, 16  ;;  %v951_v21 = vsel %vm6614_vm4, %v946_v17, %v950_v54  ;;  %v990_v18 = vshrl.u32 %v7166_v52, 16  ;;  %v7193_v54 = vld [vmem:[%s8193_s1 + $0x10] sm:$0x3] }
  0x8e   : > { %v979_v2 = vrot.slane %v977_v46, 4  ;;  %v982_v31 = vrot.slane %v980_v37, 5  ;;  %v5126_v44 = vcombine.low %v941_v32, %v951_v21  ;;  %v960_v26 = vrot.slane %v959_v55, 4  ;;  %v7199_v46 = vld [vmem:[%s6557_s27 + $0xbc] sm:$0x1]  ;;  %6378 = vmatprep.subr.msk.bf16.mxu0 %vm392_vm0, %v7193_v54 }
  0x8f   : > { %v969_v56 = vor.u32 %v968_v20, %v964_v30  ;;  %v988_v34 = vrot.slane %v986_v3, 5  ;;  %v992_v27 = vrot.slane %v990_v18, 4  ;;  %v996_v36 = vshll.u32 %v7177_v38, 16 }
  0x90   : > { %v983_v0 = vor.u32 %v982_v31, %v979_v2  ;;  %v1001_v24 = vshrl.u32 %v634_v50, 16  ;;  %5833 = vmatprep.mubr.msk.bf16.mxu1 %vm343_vm1, %v5126_v44  ;;  %v965_v32 = vsel %vm6614_vm4, %v960_v26, %v964_v30  ;;  %v1004_v37 = vshll.u32 %v634_v50, 16  ;;  %v1318_v31 = vld [vmem:[%s6557_s27] sm:$0xe]  ;;  %v1319_v26 = vld [vmem:[%s6557_s27 + $0xc] sm:$0xe] }
  0x91   : > { %v970_v17 = vrot.slane %v969_v56, 4  ;;  %v1010_v55 = vshll.u32 %v7186_v28, 16  ;;  %5984 = vmatmul.mubr.msk.bf16.gmra.mrb[4].mxu0 %vm343_vm1, %v6423_v6  ;;  %v993_v3 = vor.u32 %v992_v27, %v988_v34  ;;  %v998_v21 = vrot.slane %v996_v36, 5 }
  0x92   : > { %v984_v20 = vrot.slane %v983_v0, 4  ;;  %v1003_v2 = vrot.slane %v1001_v24, 4  ;;  %v1006_v18 = vrot.slane %v1004_v37, 5  ;;  %v1014_v50 = vshrl.u32 %v7186_v28, 16  ;;  %5987 = vmatprep.mubr.msk.bf16.mxu0 %vm343_vm1, %v6424_v57  ;;  %v1320_v37 = vld [vmem:[%s6557_s27 + $0x18] sm:$0xe] }
  0x93   : > { %v975_v30 = vsel %vm6614_vm4, %v970_v17, %v974_v5  ;;  %v1012_v44 = vrot.slane %v1010_v55, 5  ;;  %v994_v0 = vrot.slane %v993_v3, 4  ;;  %v1020_v27 = vshll.u32 %v7199_v46, 16  ;;  %v6452_v5 = vld [vmem:[%s6557_s27 + $0x4] sm:$0xf] }
  0x94   : > { %v5127_v56 = vcombine.low %v965_v32, %v975_v30  ;;  %v989_v6 = vsel %vm6614_vm4, %v984_v20, %v988_v34  ;;  %v1007_v36 = vor.u32 %v1006_v18, %v1003_v2  ;;  %v1016_v24 = vrot.slane %v1014_v50, 4  ;;  %v6425_v32 = vld [vmem:[%s6557_s27 + $0x54] sm:$0xff]   ;;  %v6426_v18 = vld [vmem:[%s6557_s27 + $0x60] sm:$0xff]  }
  0x95   : > { %v5146_v25 = vrot.slane %v1318_v31, 9  ;;  %v1387_v17 = vrot.slane %v6452_v5, 5  ;;  %v999_v57 = vsel %vm6614_vm4, %v994_v0, %v998_v21  ;;  %v1022_v55 = vrot.slane %v1020_v27, 5 }
  0x96   : > { %5834 = vmatmul.mubr.msk.bf16.gmra.mrb[24].mxu1 %vm343_vm1, %v5127_v56  ;;  %v1390_v30 = vrot.slane %v6819_v48, 5  ;;  %v5147_v34 = vrot.slane %v1319_v26, 9  ;;  %v5128_v20 = vcombine.low %v989_v6, %v999_v57  ;;  %v1008_v3 = vrot.slane %v1007_v36, 4 }
  0x97   : > { %v1017_v2 = vor.u32 %v1016_v24, %v1012_v44  ;;  %v1388_v31 = vsel %vm6741_vm7, %v5146_v25, %v1387_v17  ;;  %v1389_v50 = vrot.slane %v1387_v17, 4  ;;  %v1394_v56 = vrot.slane %v6828_v60, 5  ;;  %v1321_v25 = vld [vmem:[%s6557_s27 + $0x24] sm:$0xe] }
  0x98   : > { %v1397_v5 = vrot.slane %v6839_v11, 5  ;;  %v5148_v21 = vrot.slane %v1320_v37, 9  ;;  %5837 = vmatprep.mubr.msk.bf16.mxu1 %vm343_vm1, %v5128_v20  ;;  %v1013_v48 = vsel %vm6614_vm4, %v1008_v3, %v1012_v44  ;;  %v1401_v6 = vrot.slane %v6866_v35, 5  ;;  %v1322_v35 = vld [vmem:[%s6557_s27 + $0x30] sm:$0xe] }
  0x99   : > { %v1018_v26 = vrot.slane %v1017_v2, 4  ;;  %v1404_v0 = vrot.slane %v6878_v58, 5  ;;  %5988 = vmatmul.mubr.msk.bf16.gmra.mrb[8].mxu0 %vm343_vm1, %v6425_v32  ;;  %v1391_v60 = vsel %vm6741_vm7, %v1389_v50, %v1390_v30  ;;  %v7237_v11 = vsel %vm6741_vm7, %v5147_v34, %v1394_v56  ;;  %v1323_v34 = vld [vmem:[%s6557_s27 + $0x3c] sm:$0xe]  ;;  %v1325_v50 = vld [vmem:[%s6557_s27 + $0x54] sm:$0xe] }
  0x9a   : > { %v1396_v27 = vrot.slane %v1394_v56, 4  ;;  %v7241_v44 = vsel %vm392_vm0, %v7092_v43, 0  ;;  %v5163_v36 = vcombine.low %v1388_v31, %v1391_v60  ;;  %5991 = vmatprep.mubr.msk.bf16.mxu0 %vm343_vm1, %v6426_v18  ;;  %v1402_v24 = vsel %vm6741_vm7, %v5148_v21, %v1401_v6  ;;  %v6427_v43 = vld [vmem:[%s6557_s27 + $0x6c] sm:$0xff]   ;;  %v6428_v2 = vld [vmem:[%s6557_s27 + $0x78] sm:$0xff]   ;;  %v1324_v18 = vld [vmem:[%s6557_s27 + $0x48] sm:$0xe] }
  0x9b   : > { %v1023_v58 = vsel %vm6614_vm4, %v1018_v26, %v1022_v55  ;;  %v1403_v17 = vrot.slane %v1401_v6, 4  ;;  %v5149_v32 = vrot.slane %v1321_v25, 9  ;;  %v1408_v30 = vrot.slane %v6898_v14, 5 }
  0x9c   : > { %v5129_v37 = vcombine.low %v1013_v48, %v1023_v58  ;;  %v1398_v57 = vsel %vm6741_vm7, %v1396_v27, %v1397_v5  ;;  %v1411_v3 = vrot.slane %v6903_v15, 5  ;;  %v5150_v31 = vrot.slane %v1322_v35, 9 }
  0x9d   : > { %v5164_v55 = vcombine.low %v7237_v11, %v1398_v57  ;;  %v1405_v20 = vsel %vm6741_vm7, %v1403_v17, %v1404_v0  ;;  %v7264_v5 = vsel %vm6741_vm7, %v5149_v32, %v1408_v30  ;;  %v1410_v14 = vrot.slane %v1408_v30, 4 }
  0x9e   : > { %5838 = vmatmul.mubr.msk.bf16.gmra.mrb[28].mxu1 %vm343_vm1, %v5129_v37  ;;  %v5165_v56 = vcombine.low %v1402_v24, %v1405_v20  ;;  %v1415_v21 = vrot.slane %v6950_v9, 5  ;;  %v1418_v48 = vrot.slane %v6958_v7, 5  ;;  %v5151_v26 = vrot.slane %v1323_v34, 9  ;;  %v1326_v24 = vld [vmem:[%s6557_s27 + $0x60] sm:$0xe]  ;;  %v6429_v20 = vld [vmem:[%s6557_s27 + $0x84] sm:$0xff]  }
  0x9f   : > { %5843 = vmatprep.mubr.msk.bf16.mxu1 %vm343_vm1, %v5163_v36  ;;  %v1422_v15 = vrot.slane %v6974_v41, 5  ;;  %v1425_v6 = vrot.slane %v6977_v23, 5  ;;  %v7273_v0 = vsel %vm6741_vm7, %v1410_v14, %v1411_v3  ;;  %v5152_v9 = vrot.slane %v1324_v18, 9 }
  0xa0   : > { %v7277_v25 = vsel %vm6741_vm7, %v5150_v31, %v1415_v21  ;;  %v1417_v60 = vrot.slane %v1415_v21, 4  ;;  %v5166_v7 = vcombine.low %v7264_v5, %v7273_v0  ;;  %v1429_v11 = vrot.slane %v6999_v16, 5 }
  0xa1   : > { %v7283_v41 = vsel %vm6741_vm7, %v5151_v26, %v1422_v15  ;;  %v1424_v23 = vrot.slane %v1422_v15, 4  ;;  %5992 = vmatmul.mubr.msk.bf16.gmra.mrb[12].mxu0 %vm343_vm1, %v6427_v43  ;;  %v1432_v35 = vrot.slane %v7004_v19, 5  ;;  %v5153_v58 = vrot.slane %v1325_v50, 9  ;;  %v1327_v43 = vld [vmem:[%s6557_s27 + $0x6c] sm:$0xe] }
  0xa2   : > { %v7289_v27 = vsel %vm6741_vm7, %v1417_v60, %v1418_v48  ;;  %v1436_v36 = vrot.slane %v7019_v39, 5  ;;  %5995 = vmatprep.mubr.msk.bf16.mxu0 %vm343_vm1, %v6428_v2  ;;  %v7303_v37 = vsel %vm6741_vm7, %v5152_v9, %v1429_v11  ;;  %v1431_v57 = vrot.slane %v1429_v11, 4  ;;  %v1328_v19 = vld [vmem:[%s6557_s27 + $0x78] sm:$0xe]  ;;  %v1329_v48 = vld [vmem:[%s6557_s27 + $0x84] sm:$0xe] }
  0xa3   : > { %v5167_v17 = vcombine.low %v7277_v25, %v7289_v27  ;;  %v7299_v16 = vsel %vm6741_vm7, %v1424_v23, %v1425_v6  ;;  %v1439_v34 = vrot.slane %v7026_v10, 5  ;;  %v5154_v2 = vrot.slane %v1326_v24, 9  ;;  %v5471_v6 = vld [vmem:[%s6557_s27 + $0x18] sm:$0xf]  ;;  %v7347_v9 = vld [vmem:[%s6557_s27 + $0x1c] sm:$0xf] }
  0xa4   : > { %v5168_v39 = vcombine.low %v7283_v41, %v7299_v16  ;;  %v7311_v32 = vsel %vm6741_vm7, %v5153_v58, %v1436_v36  ;;  %v1438_v30 = vrot.slane %v1436_v36, 4  ;;  %v7317_v3 = vsel %vm6741_vm7, %v1431_v57, %v1432_v35  ;;  %v6453_v23 = vld [vmem:[%s8193_s1 + $0x8] sm:$0x3]  ;;  %v7360_v36 = vld [vmem:[%s6557_s27 + $0x20] sm:$0x1] }
  0xa5   : > { %v1443_v31 = vrot.slane %v7048_v40, 5  ;;  %v1446_v18 = vrot.slane %v7057_v22, 5  ;;  %v5169_v50 = vcombine.low %v7303_v37, %v7317_v3  ;;  %v5155_v10 = vrot.slane %v1327_v43, 9  ;;  %v6430_v40 = vld [vmem:[%s6557_s27 + $0x90] sm:$0xff]   ;;  %v5474_v43 = vld [vmem:[%s6557_s27 + $0x24] sm:$0xf] }
  0xa6   : > { %5844 = vmatmul.mubr.msk.bf16.vlgmr.msra.gmra.mrb[0].mxu1 %vm343_vm1, %v5164_v55  ;;  %v7326_v14 = vsel %vm6741_vm7, %v1438_v30, %v1439_v34  ;;  %v1450_v21 = vrot.slane %v7061_v62, 5  ;;  %v1453_v15 = vrot.slane %v7066_v13, 5  ;;  %v1457_v60 = vrot.slane %v7099_v33, 5 }
  0xa7   : > { %5847 = vmatprep.mubr.msk.bf16.mxu1 %vm343_vm1, %v5165_v56  ;;  %5876 = vmatpush3.bf16.msra.mxu1 %v7241_v44  ;;  %v5170_v22 = vcombine.low %v7311_v32, %v7326_v14  ;;  %v7337_v55 = vsel %vm6741_vm7, %v5154_v2, %v1443_v31  ;;  %v1445_v26 = vrot.slane %v1443_v31, 4  ;;  %v5156_v44 = vrot.slane %v1328_v19, 9 }
  0xa8   : > { %v7343_v62 = vsel %vm6741_vm7, %v5155_v10, %v1450_v21  ;;  %v1452_v56 = vrot.slane %v1450_v21, 4  ;;  %6374 = vmatprep.subr.msk.bf16.mxu1 %vm392_vm0, %v6453_v23  ;;  %v1460_v11 = vrot.slane %v7102_v61, 5  ;;  %v5157_v35 = vrot.slane %v1329_v48, 9  ;;  %v6432_v23 = vld [vmem:[%s6557_s27 + $0xa8] sm:$0xff]  }
  0xa9   : > { %v7355_v13 = vsel %vm6741_vm7, %v1445_v26, %v1446_v18  ;;  %v1464_v58 = vrot.slane %v7112_v29, 5  ;;  %5996 = vmatmul.mubr.msk.bf16.gmra.mrb[16].mxu0 %vm343_vm1, %v6429_v20  ;;  %v7371_v57 = vsel %vm6741_vm7, %v5156_v44, %v1457_v60  ;;  %v1459_v61 = vrot.slane %v1457_v60, 4  ;;  %v7399_v26 = vld [vmem:[%s6557_s27 + $0x2c] sm:$0x1] }
  0xaa   : > { %v5171_v33 = vcombine.low %v7337_v55, %v7355_v13  ;;  %v7367_v24 = vsel %vm6741_vm7, %v1452_v56, %v1453_v15  ;;  %5999 = vmatprep.mubr.msk.bf16.mxu0 %vm343_vm1, %v6430_v40  ;;  %v1467_v34 = vrot.slane %v7124_v45, 5  ;;  %v3754_v2 = vshrl.u32 %v5471_v6, 16  ;;  %v7396_v40 = vld [vmem:[%s6557_s27 + $0x28] sm:$0xf]  ;;  %v6431_v15 = vld [vmem:[%s6557_s27 + $0x9c] sm:$0xff]  }
  0xab   : > { %v5172_v29 = vcombine.low %v7343_v62, %v7367_v24  ;;  %v7379_v19 = vsel %vm6741_vm7, %v5157_v35, %v1464_v58  ;;  %v1466_v30 = vrot.slane %v1464_v58, 4  ;;  %v7384_v20 = vsel %vm6741_vm7, %v1459_v61, %v1460_v11  ;;  %v7516_v55 = vld [vmem:[%s6557_s27 + $0x50] sm:$0x1] }
  0xac   : > { %v3757_v31 = vshll.u32 %v5471_v6, 16  ;;  %v3763_v18 = vshll.u32 %v7347_v9, 16  ;;  %v5173_v10 = vcombine.low %v7371_v57, %v7384_v20  ;;  %v3767_v48 = vshrl.u32 %v7347_v9, 16 }
  0xad   : > { %v7391_v21 = vsel %vm6741_vm7, %v1466_v30, %v1467_v34  ;;  %v3773_v45 = vshll.u32 %v7360_v36, 16  ;;  %v3756_v56 = vrot.slane %v3754_v2, 4  ;;  %v3778_v5 = vshrl.u32 %v5474_v43, 16  ;;  %v1330_v34 = vld [vmem:[%s6557_s27 + $0x90] sm:$0xe] }
  0xae   : > { %5848 = vmatmul.mubr.msk.bf16.gmra.mrb[4].mxu1 %vm343_vm1, %v5166_v7  ;;  %v5174_v6 = vcombine.low %v7379_v19, %v7391_v21  ;;  %v3759_v44 = vrot.slane %v3757_v31, 5  ;;  %v3765_v60 = vrot.slane %v3763_v18, 5  ;;  %v3769_v11 = vrot.slane %v3767_v48, 4 }
  0xaf   : > { %5851 = vmatprep.mubr.msk.bf16.mxu1 %vm343_vm1, %v5167_v17  ;;  %v3775_v35 = vrot.slane %v3773_v45, 5  ;;  %v3781_v0 = vshll.u32 %v5474_v43, 16  ;;  %v3787_v58 = vshll.u32 %v7396_v40, 16  ;;  %v3791_v61 = vshrl.u32 %v7396_v40, 16  ;;  %v1331_v17 = vld [vmem:[%s6557_s27 + $0x9c] sm:$0xe] }
  0xb0   : > { %v3760_v7 = vor.u32 %v3759_v44, %v3756_v56  ;;  %v3797_v30 = vshll.u32 %v7399_v26, 16  ;;  %v3770_v2 = vor.u32 %v3769_v11, %v3765_v60  ;;  %v3780_v31 = vrot.slane %v3778_v5, 4  ;;  %v5477_v56 = vld [vmem:[%s6557_s27 + $0x30] sm:$0xf] }
  0xb1   : > { %v3783_v25 = vrot.slane %v3781_v0, 5  ;;  %v7419_v27 = vsel %vm392_vm0, %v7193_v54, 0  ;;  %6000 = vmatmul.mubr.msk.bf16.gmra.mrb[20].mxu0 %vm343_vm1, %v6431_v15  ;;  %v3789_v18 = vrot.slane %v3787_v58, 5  ;;  %v3793_v48 = vrot.slane %v3791_v61, 4  ;;  %v6433_v58 = vld [vmem:[%s6557_s27 + $0xb4] sm:$0xff]  }
  0xb2   : > { %v3761_v43 = vrot.slane %v3760_v7, 4  ;;  %v3799_v45 = vrot.slane %v3797_v30, 5  ;;  %6003 = vmatprep.mubr.msk.bf16.mxu0 %vm343_vm1, %v6432_v23  ;;  %v3771_v44 = vrot.slane %v3770_v2, 4  ;;  %v5158_v5 = vrot.slane %v1330_v34, 9  ;;  %v7437_v34 = vld [vmem:[%s6557_s27 + $0x34] sm:$0xf] }
  0xb3   : > { %v3784_v11 = vor.u32 %v3783_v25, %v3780_v31  ;;  %v1471_v0 = vrot.slane %v7131_v49, 5  ;;  %v3794_v53 = vor.u32 %v3793_v48, %v3789_v18  ;;  %v1474_v15 = vrot.slane %v7137_v59, 5  ;;  %v6434_v59 = vld [vmem:[%s6557_s27 + $0xc0] sm:$0xff]   ;;  %v7449_v25 = vld [vmem:[%s6557_s27 + $0x38] sm:$0x1] }
  0xb4   : > { %v3766_v54 = vsel %vm6614_vm4, %v3761_v43, %v3765_v60  ;;  %v5159_v7 = vrot.slane %v1331_v17, 9  ;;  %v3776_v61 = vsel %vm6614_vm4, %v3771_v44, %v3775_v35  ;;  %v1478_v2 = vrot.slane %v7144_v51, 5  ;;  %v5480_v17 = vld [vmem:[%s6557_s27 + $0x3c] sm:$0xf]  ;;  %v7463_v51 = vld [vmem:[%s6557_s27 + $0x40] sm:$0xf] }
  0xb5   : > { %v3785_v30 = vrot.slane %v3784_v11, 4  ;;  %v7434_v23 = vsel %vm6741_vm7, %v5158_v5, %v1471_v0  ;;  %v1473_v49 = vrot.slane %v1471_v0, 4  ;;  %v7444_v60 = vcombine.low %v3766_v54, %v3776_v61  ;;  %v7474_v43 = vld [vmem:[%s6557_s27 + $0x44] sm:$0x1] }
  0xb6   : > { %5852 = vmatmul.mubr.msk.bf16.gmra.mrb[8].mxu1 %vm343_vm1, %v5168_v39  ;;  %v3795_v35 = vrot.slane %v3794_v53, 4  ;;  %v1481_v31 = vrot.slane %v7155_v8, 5  ;;  %v3802_v39 = vshrl.u32 %v5477_v56, 16  ;;  %v3805_v53 = vshll.u32 %v5477_v56, 16 }
  0xb7   : > { %5855 = vmatprep.mubr.msk.bf16.mxu1 %vm343_vm1, %v5169_v50  ;;  %v3790_v41 = vsel %vm6614_vm4, %v3785_v30, %v3789_v18  ;;  %v7459_v16 = vsel %vm6741_vm7, %v1473_v49, %v1474_v15  ;;  %v7471_v3 = vsel %vm6741_vm7, %v5159_v7, %v1478_v2  ;;  %v1480_v50 = vrot.slane %v1478_v2, 4 }
  0xb8   : > { %v3800_v8 = vsel %vm6614_vm4, %v3795_v35, %v3799_v45  ;;  %v5175_v37 = vcombine.low %v7434_v23, %v7459_v16  ;;  %v3804_v48 = vrot.slane %v3802_v39, 4  ;;  %v3807_v56 = vrot.slane %v3805_v53, 5  ;;  %v6435_v53 = vld [vmem:[%s6557_s27 + $0xcc] sm:$0xff]  }
  0xb9   : > { %v7476_v18 = vcombine.low %v3790_v41, %v3800_v8  ;;  %v3811_v44 = vshll.u32 %v7437_v34, 16  ;;  %6004 = vmatmul.mubr.msk.bf16.gmra.mrb[24].mxu0 %vm343_vm1, %v6433_v58  ;;  %v7482_v45 = vsel %vm6741_vm7, %v1480_v50, %v1481_v31  ;;  %v3815_v11 = vshrl.u32 %v7437_v34, 16  ;;  %v1332_v58 = vld [vmem:[%s6557_s27 + $0xa8] sm:$0xe] }
  0xba   : > { %v3821_v5 = vshll.u32 %v7449_v25, 16  ;;  %v3826_v0 = vshrl.u32 %v5480_v17, 16  ;;  %6007 = vmatprep.mubr.msk.bf16.mxu0 %vm343_vm1, %v6434_v59  ;;  %v5176_v54 = vcombine.low %v7471_v3, %v7482_v45  ;;  %v3808_v15 = vor.u32 %v3807_v56, %v3804_v48  ;;  %v1333_v56 = vld [vmem:[%s6557_s27 + $0xb4] sm:$0xe] }
  0xbb   : > { %v3813_v7 = vrot.slane %v3811_v44, 5  ;;  %v3829_v61 = vshll.u32 %v5480_v17, 16  ;;  %v3817_v30 = vrot.slane %v3815_v11, 4  ;;  %v3835_v2 = vshll.u32 %v7463_v51, 16  ;;  %v5483_v11 = vld [vmem:[%s6557_s27 + $0x48] sm:$0xf] }
  0xbc   : > { %v3823_v49 = vrot.slane %v3821_v5, 5  ;;  %v3828_v35 = vrot.slane %v3826_v0, 4  ;;  %v3809_v31 = vrot.slane %v3808_v15, 4  ;;  %v3839_v39 = vshrl.u32 %v7463_v51, 16 }
  0xbd   : > { %v3831_v41 = vrot.slane %v3829_v61, 5  ;;  %v3845_v59 = vshll.u32 %v7474_v43, 16  ;;  %v3818_v17 = vor.u32 %v3817_v30, %v3813_v7  ;;  %v3837_v8 = vrot.slane %v3835_v2, 5  ;;  %v7513_v61 = vld [vmem:[%s6557_s27 + $0x4c] sm:$0xf] }
  0xbe   : > { %5856 = vmatmul.mubr.msk.bf16.gmra.mrb[12].mxu1 %vm343_vm1, %v5170_v22  ;;  %v5160_v50 = vrot.slane %v1332_v58, 9  ;;  %v1485_v48 = vrot.slane %v7166_v52, 5  ;;  %v3814_v44 = vsel %vm6614_vm4, %v3809_v31, %v3813_v7  ;;  %v3841_v14 = vrot.slane %v3839_v39, 4 }
  0xbf   : > { %5859 = vmatprep.mubr.msk.bf16.mxu1 %vm343_vm1, %v5171_v33  ;;  %v3832_v32 = vor.u32 %v3831_v41, %v3828_v35  ;;  %v3847_v22 = vrot.slane %v3845_v59, 5  ;;  %v3819_v5 = vrot.slane %v3818_v17, 4  ;;  %v1488_v52 = vrot.slane %v7177_v38, 5  ;;  %v7535_v59 = vld [vmem:[%s6557_s27 + $0x58] sm:$0xf] }
  0xc0   : > { %v7509_v0 = vsel %vm6741_vm7, %v5160_v50, %v1485_v48  ;;  %v1487_v15 = vrot.slane %v1485_v48, 4  ;;  %v3842_v33 = vor.u32 %v3841_v14, %v3837_v8  ;;  %v5161_v7 = vrot.slane %v1333_v56, 9  ;;  %v7542_v48 = vld [vmem:[%s6557_s27 + $0x5c] sm:$0x1] }
  0xc1   : > { %v3833_v13 = vrot.slane %v3832_v32, 4  ;;  %v1492_v58 = vrot.slane %v7186_v28, 5  ;;  %6008 = vmatmul.mubr.msk.bf16.gmra.mrb[28].mxu0 %vm343_vm1, %v6435_v53  ;;  %v3824_v30 = vsel %vm6614_vm4, %v3819_v5, %v3823_v49  ;;  %v1495_v35 = vrot.slane %v7199_v46, 5  ;;  %v5486_v49 = vld [vmem:[%s6557_s27 + $0x54] sm:$0xf] }
  0xc2   : > { %v7524_v38 = vsel %vm6741_vm7, %v1487_v15, %v1488_v52  ;;  %v3850_v2 = vshrl.u32 %v5483_v11, 16  ;;  %6013 = vmatprep.mubr.msk.bf16.mxu0 %vm343_vm1, %v7444_v60  ;;  %v5522_v31 = vcombine.low %v3814_v44, %v3824_v30  ;;  %v3843_v41 = vrot.slane %v3842_v33, 4  ;;  %v5489_v60 = vld [vmem:[%s6557_s27 + $0x60] sm:$0xf]  ;;  %v7569_v30 = vld [vmem:[%s6557_s27 + $0x68] sm:$0x1] }
  0xc3   : > { %v3838_v28 = vsel %vm6614_vm4, %v3833_v13, %v3837_v8  ;;  %v5177_v39 = vcombine.low %v7509_v0, %v7524_v38  ;;  %v7539_v53 = vsel %vm6741_vm7, %v5161_v7, %v1492_v58  ;;  %v1494_v46 = vrot.slane %v1492_v58, 4  ;;  %v7565_v13 = vld [vmem:[%s6557_s27 + $0x64] sm:$0xf] }
  0xc4   : > { %v3852_v17 = vrot.slane %v3850_v2, 4  ;;  %v3853_v50 = vshll.u32 %v5483_v11, 16  ;;  %v3848_v8 = vsel %vm6614_vm4, %v3843_v41, %v3847_v22  ;;  %v3859_v56 = vshll.u32 %v7513_v61, 16 }
  0xc5   : > { %v3863_v44 = vshrl.u32 %v7513_v61, 16  ;;  %v3869_v32 = vshll.u32 %v7516_v55, 16  ;;  %v5523_v14 = vcombine.low %v3838_v28, %v3848_v8  ;;  %v7556_v11 = vsel %vm6741_vm7, %v1494_v46, %v1495_v35 }
  0xc6   : > { %5860 = vmatmul.mubr.msk.bf16.gmra.mrb[16].mxu1 %vm343_vm1, %v5172_v29  ;;  %v3855_v5 = vrot.slane %v3853_v50, 5  ;;  %v3874_v15 = vshrl.u32 %v5486_v49, 16  ;;  %v5178_v22 = vcombine.low %v7539_v53, %v7556_v11  ;;  %v3861_v52 = vrot.slane %v3859_v56, 5  ;;  %v7673_v11 = vld [vmem:[%s6557_s27 + $0xa4] sm:$0x1] }
  0xc7   : > { %5863 = vmatprep.mubr.msk.bf16.mxu1 %vm343_vm1, %v5173_v10  ;;  %v3865_v62 = vrot.slane %v3863_v44, 4  ;;  %v3871_v24 = vrot.slane %v3869_v32, 5  ;;  %v3877_v7 = vshll.u32 %v5486_v49, 16  ;;  %v3883_v58 = vshll.u32 %v7535_v59, 16 }
  0xc8   : > { %v3856_v29 = vor.u32 %v3855_v5, %v3852_v17  ;;  %v3876_v33 = vrot.slane %v3874_v15, 4  ;;  %v3887_v57 = vshrl.u32 %v7535_v59, 16  ;;  %v3893_v20 = vshll.u32 %v7542_v48, 16  ;;  %v5492_v5 = vld [vmem:[%s6557_s27 + $0x6c] sm:$0xf] }
  0xc9   : > { %v3866_v35 = vor.u32 %v3865_v62, %v3861_v52  ;;  %v3898_v10 = vshrl.u32 %v5489_v60, 16  ;;  %6014 = vmatmul.mubr.msk.bf16.vlgmr.msra.gmra.mrb[0].mxu0 %vm343_vm1, %v7476_v18  ;;  %v3879_v28 = vrot.slane %v3877_v7, 5  ;;  %v3885_v41 = vrot.slane %v3883_v58, 5  ;;  %v7586_v62 = vld [vmem:[%s6557_s27 + $0x70] sm:$0xf] }
  0xca   : > { %v3857_v2 = vrot.slane %v3856_v29, 4  ;;  %v3901_v46 = vshll.u32 %v5489_v60, 16  ;;  %6046 = vmatpush3.bf16.msra.mxu0 %v7419_v27  ;;  %6017 = vmatprep.mubr.msk.bf16.mxu0 %vm343_vm1, %v5522_v31  ;;  %v3889_v17 = vrot.slane %v3887_v57, 4  ;;  %v3895_v50 = vrot.slane %v3893_v20, 5  ;;  %v7597_v57 = vld [vmem:[%s6557_s27 + $0x74] sm:$0x1] }
  0xcb   : > { %v3867_v49 = vrot.slane %v3866_v35, 4  ;;  %v3900_v8 = vrot.slane %v3898_v10, 4  ;;  %v3880_v44 = vor.u32 %v3879_v28, %v3876_v33  ;;  %v3907_v18 = vshll.u32 %v7565_v13, 16 }
  0xcc   : > { %v3862_v56 = vsel %vm6614_vm4, %v3857_v2, %v3861_v52  ;;  %v3903_v32 = vrot.slane %v3901_v46, 5  ;;  %v3890_v15 = vor.u32 %v3889_v17, %v3885_v41  ;;  %v3911_v27 = vshrl.u32 %v7565_v13, 16  ;;  %v5495_v2 = vld [vmem:[%s6557_s27 + $0x78] sm:$0xf]  ;;  %v7607_v46 = vld [vmem:[%s6557_s27 + $0x7c] sm:$0xf] }
  0xcd   : > { %v3872_v60 = vsel %vm6614_vm4, %v3867_v49, %v3871_v24  ;;  %v3917_v31 = vshll.u32 %v7569_v30, 16  ;;  %v3881_v29 = vrot.slane %v3880_v44, 4  ;;  %v3909_v7 = vrot.slane %v3907_v18, 5 }
  0xce   : > { %5864 = vmatmul.mubr.msk.bf16.gmra.mrb[20].mxu1 %vm343_vm1, %v5174_v6  ;;  %v5524_v52 = vcombine.low %v3862_v56, %v3872_v60  ;;  %v3904_v33 = vor.u32 %v3903_v32, %v3900_v8  ;;  %v3891_v24 = vrot.slane %v3890_v15, 4  ;;  %v3913_v58 = vrot.slane %v3911_v27, 4  ;;  %v7615_v32 = vld [vmem:[%s6557_s27 + $0x80] sm:$0x1]  ;;  %v5498_v27 = vld [vmem:[%s6557_s27 + $0x84] sm:$0xf] }
  0xcf   : > { %5867 = vmatprep.mubr.msk.bf16.mxu1 %vm343_vm1, %v5175_v37  ;;  %v3919_v35 = vrot.slane %v3917_v31, 5  ;;  %v3922_v20 = vshrl.u32 %v5492_v5, 16  ;;  %v3886_v19 = vsel %vm6614_vm4, %v3881_v29, %v3885_v41  ;;  %v3925_v6 = vshll.u32 %v5492_v5, 16 }
  0xd0   : > { %v3905_v21 = vrot.slane %v3904_v33, 4  ;;  %v3931_v10 = vshll.u32 %v7586_v62, 16  ;;  %v3896_v23 = vsel %vm6614_vm4, %v3891_v24, %v3895_v50  ;;  %v3914_v16 = vor.u32 %v3913_v58, %v3909_v7 }
  0xd1   : > { %v3924_v37 = vrot.slane %v3922_v20, 4  ;;  %v3935_v28 = vshrl.u32 %v7586_v62, 16  ;;  %6018 = vmatmul.mubr.msk.bf16.gmra.mrb[4].mxu0 %vm343_vm1, %v5523_v14  ;;  %v5525_v49 = vcombine.low %v3886_v19, %v3896_v23  ;;  %v3927_v17 = vrot.slane %v3925_v6, 5 }
  0xd2   : > { %v3910_v41 = vsel %vm6614_vm4, %v3905_v21, %v3909_v7  ;;  %v3933_v8 = vrot.slane %v3931_v10, 5  ;;  %6021 = vmatprep.mubr.msk.bf16.mxu0 %vm343_vm1, %v5524_v52  ;;  %v3915_v56 = vrot.slane %v3914_v16, 4  ;;  %v3941_v44 = vshll.u32 %v7597_v57, 16  ;;  %v7623_v7 = vld [vmem:[%s6557_s27 + $0x88] sm:$0xf] }
  0xd3   : > { %v3937_v50 = vrot.slane %v3935_v28, 4  ;;  %v3946_v18 = vshrl.u32 %v5495_v2, 16  ;;  %v3928_v5 = vor.u32 %v3927_v17, %v3924_v37  ;;  %v3949_v60 = vshll.u32 %v5495_v2, 16  ;;  %v5501_v16 = vld [vmem:[%s6557_s27 + $0x90] sm:$0xf] }
  0xd4   : > { %v3955_v14 = vshll.u32 %v7607_v46, 16  ;;  %v3959_v15 = vshrl.u32 %v7607_v46, 16  ;;  %v3920_v31 = vsel %vm6614_vm4, %v3915_v56, %v3919_v35  ;;  %v3943_v52 = vrot.slane %v3941_v44, 5  ;;  %v7644_v28 = vld [vmem:[%s6557_s27 + $0x94] sm:$0xf] }
  0xd5   : > { %v3938_v29 = vor.u32 %v3937_v50, %v3933_v8  ;;  %v3948_v33 = vrot.slane %v3946_v18, 4  ;;  %v5526_v24 = vcombine.low %v3910_v41, %v3920_v31  ;;  %v3929_v58 = vrot.slane %v3928_v5, 4  ;;  %v6436_v50 = vld [vmem:[%s6557_s27 + $0xc] sm:$0xff]  }
  0xd6   : > { %5868 = vmatmul.mubr.msk.bf16.gmra.mrb[24].mxu1 %vm343_vm1, %v5176_v54  ;;  %v3951_v20 = vrot.slane %v3949_v60, 5  ;;  %v3957_v19 = vrot.slane %v3955_v14, 5  ;;  %v3961_v21 = vrot.slane %v3959_v15, 4  ;;  %v3965_v6 = vshll.u32 %v7615_v32, 16  ;;  %v7637_v54 = vld [vmem:[%s6557_s27 + $0x8c] sm:$0x1] }
  0xd7   : > { %5871 = vmatprep.mubr.msk.bf16.mxu1 %vm343_vm1, %v5177_v39  ;;  %v3939_v35 = vrot.slane %v3938_v29, 4  ;;  %v3970_v10 = vshrl.u32 %v5498_v27, 16  ;;  %v3934_v3 = vsel %vm6614_vm4, %v3929_v58, %v3933_v8  ;;  %v3973_v2 = vshll.u32 %v5498_v27, 16  ;;  %v5504_v29 = vld [vmem:[%s6557_s27 + $0x9c] sm:$0xf] }
  0xd8   : > { %v3952_v45 = vor.u32 %v3951_v20, %v3948_v33  ;;  %v3979_v23 = vshll.u32 %v7623_v7, 16  ;;  %v3962_v38 = vor.u32 %v3961_v21, %v3957_v19  ;;  %v3967_v39 = vrot.slane %v3965_v6, 5  ;;  %v7661_v20 = vld [vmem:[%s6557_s27 + $0xa0] sm:$0xf] }
  0xd9   : > { %v3944_v0 = vsel %vm6614_vm4, %v3939_v35, %v3943_v52  ;;  %v3972_v37 = vrot.slane %v3970_v10, 4  ;;  %6022 = vmatmul.mubr.msk.bf16.gmra.mrb[8].mxu0 %vm343_vm1, %v5525_v49  ;;  %v3975_v8 = vrot.slane %v3973_v2, 5  ;;  %v3983_v18 = vshrl.u32 %v7623_v7, 16  ;;  %v7654_v49 = vld [vmem:[%s6557_s27 + $0x98] sm:$0x1] }
  0xda   : > { %v5527_v41 = vcombine.low %v3934_v3, %v3944_v0  ;;  %v3953_v17 = vrot.slane %v3952_v45, 4  ;;  %v3981_v56 = vrot.slane %v3979_v23, 5  ;;  %6025 = vmatprep.mubr.msk.bf16.mxu0 %vm343_vm1, %v5526_v24  ;;  %v3963_v44 = vrot.slane %v3962_v38, 4  ;;  %v5507_v0 = vld [vmem:[%s6557_s27 + $0xa8] sm:$0xf] }
  0xdb   : > { %v3989_v5 = vshll.u32 %v7637_v54, 16  ;;  %v3994_v60 = vshrl.u32 %v5501_v16, 16  ;;  %v3976_v15 = vor.u32 %v3975_v8, %v3972_v37  ;;  %v3997_v27 = vshll.u32 %v5501_v16, 16  ;;  %v6437_v8 = vld [vmem:[%s6557_s27 + $0x18] sm:$0xff]  }
  0xdc   : > { %v3958_v14 = vsel %vm6614_vm4, %v3953_v17, %v3957_v19  ;;  %v4003_v31 = vshll.u32 %v7644_v28, 16  ;;  %v3968_v52 = vsel %vm6614_vm4, %v3963_v44, %v3967_v39  ;;  %v3985_v33 = vrot.slane %v3983_v18, 4 }
  0xdd   : > { %v3991_v24 = vrot.slane %v3989_v5, 5  ;;  %v3996_v58 = vrot.slane %v3994_v60, 4  ;;  %v5528_v19 = vcombine.low %v3958_v14, %v3968_v52  ;;  %v3977_v35 = vrot.slane %v3976_v15, 4  ;;  %v6438_v5 = vld [vmem:[%s6557_s27 + $0x24] sm:$0xff]  }
  0xde   : > { %5872 = vmatmul.mubr.msk.bf16.gmra.mrb[28].mxu1 %vm343_vm1, %v5178_v22  ;;  %v3999_v21 = vrot.slane %v3997_v27, 5  ;;  %v4005_v6 = vrot.slane %v4003_v31, 5  ;;  %v3986_v10 = vor.u32 %v3985_v33, %v3981_v56  ;;  %v4007_v3 = vshrl.u32 %v7644_v28, 16  ;;  %v7686_v27 = vld [vmem:[%s6557_s27 + $0xac] sm:$0xf] }
  0xdf   : > { %5877 = vmatprep.mubr.msk.bf16.mxu1 %vm343_vm1, %v6436_v50  ;;  %v4013_v45 = vshll.u32 %v7654_v49, 16  ;;  %v4018_v2 = vshrl.u32 %v5504_v29, 16  ;;  %v3982_v23 = vsel %vm6614_vm4, %v3977_v35, %v3981_v56  ;;  %v4021_v22 = vshll.u32 %v5504_v29, 16  ;;  %v5510_v35 = vld [vmem:[%s6557_s27 + $0xb4] sm:$0xf] }
  0xe0   : > { %v4000_v53 = vor.u32 %v3999_v21, %v3996_v58  ;;  %v4027_v16 = vshll.u32 %v7661_v20, 16  ;;  %v3987_v38 = vrot.slane %v3986_v10, 4  ;;  %v4009_v39 = vrot.slane %v4007_v3, 4  ;;  %v7691_v58 = vld [vmem:[%s6557_s27 + $0xb0] sm:$0x1] }
  0xe1   : > { %v4015_v37 = vrot.slane %v4013_v45, 5  ;;  %v4020_v17 = vrot.slane %v4018_v2, 4  ;;  %6026 = vmatmul.mubr.msk.bf16.gmra.mrb[12].mxu0 %vm343_vm1, %v5527_v41  ;;  %v4023_v56 = vrot.slane %v4021_v22, 5  ;;  %v4031_v18 = vshrl.u32 %v7661_v20, 16 }
  0xe2   : > { %v4001_v50 = vrot.slane %v4000_v53, 4  ;;  %v4029_v44 = vrot.slane %v4027_v16, 5  ;;  %6029 = vmatprep.mubr.msk.bf16.mxu0 %vm343_vm1, %v5528_v19  ;;  %v3992_v60 = vsel %vm6614_vm4, %v3987_v38, %v3991_v24  ;;  %v4010_v14 = vor.u32 %v4009_v39, %v4005_v6  ;;  %v7703_v16 = vld [vmem:[%s6557_s27 + $0xb8] sm:$0xf] }
  0xe3   : > { %v4037_v15 = vshll.u32 %v7673_v11, 16  ;;  %v4042_v31 = vshrl.u32 %v5507_v0, 16  ;;  %v5529_v41 = vcombine.low %v3982_v23, %v3992_v60  ;;  %v4024_v52 = vor.u32 %v4023_v56, %v4020_v17  ;;  %v6439_v60 = vld [vmem:[%s6557_s27 + $0x30] sm:$0xff]  }
  0xe4   : > { %v4006_v29 = vsel %vm6614_vm4, %v4001_v50, %v4005_v6  ;;  %v4033_v33 = vrot.slane %v4031_v18, 4  ;;  %v4011_v19 = vrot.slane %v4010_v14, 4  ;;  %v4045_v24 = vshll.u32 %v5507_v0, 16  ;;  %v7708_v50 = vld [vmem:[%s6557_s27 + $0xbc] sm:$0x1] }
  0xe5   : > { %v4039_v21 = vrot.slane %v4037_v15, 5  ;;  %v4044_v10 = vrot.slane %v4042_v31, 4  ;;  %v4025_v3 = vrot.slane %v4024_v52, 4  ;;  %v4051_v2 = vshll.u32 %v7686_v27, 16 }
  0xe6   : > { %5878 = vmatmul.mubr.msk.bf16.vlgmr.msra.gmra.mrb[0].mxu1 %vm343_vm1, %v6437_v8  ;;  %v4034_v45 = vor.u32 %v4033_v33, %v4029_v44  ;;  %v4055_v23 = vshrl.u32 %v7686_v27, 16  ;;  %v4016_v6 = vsel %vm6614_vm4, %v4011_v19, %v4015_v37  ;;  %v4047_v53 = vrot.slane %v4045_v24, 5  ;;  %v7721_v24 = vld [vmem:[%s6557_s27 + $0xc4] sm:$0xf] }
  0xe7   : > { %5881 = vmatprep.mubr.msk.bf16.mxu1 %vm343_vm1, %v6438_v5  ;;  %6080 = vmatpush3.bf16.msra.mxu1 %v6545_v4  ;;  %v4061_v22 = vshll.u32 %v7691_v58, 16  ;;  %v4066_v0 = vshrl.u32 %v5510_v35, 16  ;;  %v5530_v38 = vcombine.low %v4006_v29, %v4016_v6  ;;  %v4030_v39 = vsel %vm6614_vm4, %v4025_v3, %v4029_v44  ;;  %v5513_v5 = vld [vmem:[%s6557_s27 + $0xc0] sm:$0xf] }
  0xe8   : > { %v4035_v17 = vrot.slane %v4034_v45, 4  ;;  %v4053_v8 = vrot.slane %v4051_v2, 5  ;;  %v4048_v4 = vor.u32 %v4047_v53, %v4044_v10  ;;  %v4057_v56 = vrot.slane %v4055_v23, 4  ;;  %v6440_v29 = vld [vmem:[%s6557_s27 + $0x3c] sm:$0xff]  }
  0xe9   : > { %v4063_v18 = vrot.slane %v4061_v22, 5  ;;  %v4068_v37 = vrot.slane %v4066_v0, 4  ;;  %6030 = vmatmul.mubr.msk.bf16.gmra.mrb[16].mxu0 %vm343_vm1, %v5529_v41  ;;  %v4069_v15 = vshll.u32 %v5510_v35, 16  ;;  %v4075_v44 = vshll.u32 %v7703_v16, 16 }
  0xea   : > { %v4040_v14 = vsel %vm6614_vm4, %v4035_v17, %v4039_v21  ;;  %v4079_v31 = vshrl.u32 %v7703_v16, 16  ;;  %6033 = vmatprep.mubr.msk.bf16.mxu0 %vm343_vm1, %v5530_v38  ;;  %v4049_v33 = vrot.slane %v4048_v4, 4  ;;  %v4058_v19 = vor.u32 %v4057_v56, %v4053_v8  ;;  %v7724_v21 = vld [vmem:[%s6557_s27 + $0xc8] sm:$0x1]  ;;  %v5516_v17 = vld [vmem:[%s6557_s27 + $0xcc] sm:$0xf] }
  0xeb   : > { %v5531_v52 = vcombine.low %v4030_v39, %v4040_v14  ;;  %v4085_v10 = vshll.u32 %v7708_v50, 16  ;;  %v4071_v41 = vrot.slane %v4069_v15, 5  ;;  %v4077_v3 = vrot.slane %v4075_v44, 5  ;;  %v7737_v14 = vld [vmem:[%s6557_s27 + $0xd0] sm:$0xf] }
  0xec   : > { %v4081_v45 = vrot.slane %v4079_v31, 4  ;;  %v4090_v35 = vshrl.u32 %v5513_v5, 16  ;;  %v4054_v2 = vsel %vm6614_vm4, %v4049_v33, %v4053_v8  ;;  %v4059_v23 = vrot.slane %v4058_v19, 4 }
  0xed   : > { %v4087_v6 = vrot.slane %v4085_v10, 5  ;;  %v4093_v53 = vshll.u32 %v5513_v5, 16  ;;  %v4072_v22 = vor.u32 %v4071_v41, %v4068_v37  ;;  %v4099_v39 = vshll.u32 %v7721_v24, 16 }
  0xee   : > { %5882 = vmatmul.mubr.msk.bf16.gmra.mrb[4].mxu1 %vm343_vm1, %v6439_v60  ;;  %v4082_v0 = vor.u32 %v4081_v45, %v4077_v3  ;;  %v4092_v38 = vrot.slane %v4090_v35, 4  ;;  %v4064_v4 = vsel %vm6614_vm4, %v4059_v23, %v4063_v18  ;;  %v4103_v8 = vshrl.u32 %v7721_v24, 16  ;;  %v6441_v18 = vld [vmem:[%s6557_s27 + $0x48] sm:$0xff]   ;;  %v5552_v23 = vld [vmem:[%s6557_s27 + $0x18] sm:$0xe] }
  0xef   : > { %5885 = vmatprep.mubr.msk.bf16.mxu1 %vm343_vm1, %v6440_v29  ;;  %v4095_v56 = vrot.slane %v4093_v53, 5  ;;  %v4109_v5 = vshll.u32 %v7724_v21, 16  ;;  %v5532_v37 = vcombine.low %v4054_v2, %v4064_v4  ;;  %v4073_v60 = vrot.slane %v4072_v22, 4  ;;  %v7740_v29 = vld [vmem:[%s6557_s27 + $0xd4] sm:$0x1] }
  0xf0   : > { %v4083_v15 = vrot.slane %v4082_v0, 4  ;;  %v4101_v44 = vrot.slane %v4099_v39, 5  ;;  %v4105_v33 = vrot.slane %v4103_v8, 4  ;;  %v4114_v10 = vshrl.u32 %v5516_v17, 16  ;;  %v6442_v53 = vld [vmem:[%s6557_s27 + $0x54] sm:$0xff]  }
  0xf1   : > { %v4096_v31 = vor.u32 %v4095_v56, %v4092_v38  ;;  %v4111_v19 = vrot.slane %v4109_v5, 5  ;;  %6034 = vmatmul.mubr.msk.bf16.gmra.mrb[20].mxu0 %vm343_vm1, %v5531_v52  ;;  %v4078_v41 = vsel %vm6614_vm4, %v4073_v60, %v4077_v3  ;;  %v4117_v35 = vshll.u32 %v5516_v17, 16  ;;  %v5553_v8 = vld [vmem:[%s6557_s27 + $0x24] sm:$0xe] }
  0xf2   : > { %v4088_v45 = vsel %vm6614_vm4, %v4083_v15, %v4087_v6  ;;  %v4123_v2 = vshll.u32 %v7737_v14, 16  ;;  %6037 = vmatprep.mubr.msk.bf16.mxu0 %vm343_vm1, %v5532_v37  ;;  %v4106_v38 = vor.u32 %v4105_v33, %v4101_v44  ;;  %v4116_v39 = vrot.slane %v4114_v10, 4  ;;  %v5554_v10 = vld [vmem:[%s6557_s27 + $0x30] sm:$0xe] }
  0xf3   : > { %v5533_v22 = vcombine.low %v4078_v41, %v4088_v45  ;;  %v4097_v0 = vrot.slane %v4096_v31, 4  ;;  %v4119_v52 = vrot.slane %v4117_v35, 5  ;;  %v4127_v56 = vshrl.u32 %v7737_v14, 16 }
  0xf4   : > { %v4125_v4 = vrot.slane %v4123_v2, 5  ;;  %v4133_v3 = vshll.u32 %v7740_v29, 16  ;;  %v4107_v17 = vrot.slane %v4106_v38, 4  ;;  %v5568_v5 = vrot.slane %v5552_v23, 9 }
  0xf5   : > { %v4102_v6 = vsel %vm6614_vm4, %v4097_v0, %v4101_v44  ;;  %v4497_v60 = vrot.slane %v7347_v9, 5  ;;  %v4120_v37 = vor.u32 %v4119_v52, %v4116_v39  ;;  %v4129_v15 = vrot.slane %v4127_v56, 4  ;;  %v5555_v39 = vld [vmem:[%s6557_s27 + $0x3c] sm:$0xe] }
  0xf6   : > { %5886 = vmatmul.mubr.msk.bf16.gmra.mrb[8].mxu1 %vm343_vm1, %v6441_v18  ;;  %v4135_v31 = vrot.slane %v4133_v3, 5  ;;  %v4500_v33 = vrot.slane %v7360_v36, 5  ;;  %v4112_v41 = vsel %vm6614_vm4, %v4107_v17, %v4111_v19  ;;  %v5569_v9 = vrot.slane %v5553_v8, 9  ;;  %v6443_v3 = vld [vmem:[%s6557_s27 + $0x60] sm:$0xff]   ;;  %v5556_v8 = vld [vmem:[%s6557_s27 + $0x48] sm:$0xe] }
  0xf7   : > { %5889 = vmatprep.mubr.msk.bf16.mxu1 %vm343_vm1, %v6442_v53  ;;  %v4498_v44 = vsel %vm6741_vm7, %v5568_v5, %v4497_v60  ;;  %v4499_v45 = vrot.slane %v4497_v60, 4  ;;  %v5534_v18 = vcombine.low %v4102_v6, %v4112_v41  ;;  %v4121_v35 = vrot.slane %v4120_v37, 4  ;;  %v6444_v6 = vld [vmem:[%s6557_s27 + $0x6c] sm:$0xff]  }
  0xf8   : > { %v4130_v2 = vor.u32 %v4129_v15, %v4125_v4  ;;  %v4504_v23 = vrot.slane %v7396_v40, 5  ;;  %v8200_v36 = vshll.u32 %v6934_v12, 16  ;;  %v5570_v19 = vrot.slane %v5554_v10, 9  ;;  %v5557_v15 = vld [vmem:[%s6557_s27 + $0x54] sm:$0xe] }
  0xf9   : > { %v4501_v53 = vsel %vm6741_vm7, %v4499_v45, %v4500_v33  ;;  %v4511_v38 = vrot.slane %v7437_v34, 5  ;;  %v8201_v52 = vor.u32 %v6946_v1, %v6936_v63  ;;  %6038 = vmatmul.mubr.msk.bf16.gmra.mrb[24].mxu0 %vm343_vm1, %v5533_v22  ;;  %v4507_v12 = vrot.slane %v7399_v26, 5 }
  0xfa   : > { %v7769_v0 = vrot.slane %v8200_v36, 5  ;;  %v4131_v40 = vrot.slane %v4130_v2, 4  ;;  %6041 = vmatprep.mubr.msk.bf16.mxu0 %vm343_vm1, %v5534_v18  ;;  %v4126_v34 = vsel %vm6614_vm4, %v4121_v35, %v4125_v4  ;;  %v5585_v17 = vcombine.low %v4498_v44, %v4501_v53  ;;  %v5284_v44 = vld [vmem:[%s6557_s27 + $0x6c] sm:$0xf] }
  0xfb   : > { %v7778_v56 = vrot.slane %v8201_v52, 4  ;;  %v7790_v1 = vsel %vm6741_vm7, %v5569_v9, %v4504_v23  ;;  %v4506_v5 = vrot.slane %v4504_v23, 4  ;;  %v5571_v60 = vrot.slane %v5555_v39, 9  ;;  %v6445_v39 = vld [vmem:[%s6557_s27 + $0x78] sm:$0xff]  }
  0xfc   : > { %v4136_v22 = vsel %vm6614_vm4, %v4131_v40, %v4135_v31  ;;  %v4518_v26 = vrot.slane %v7463_v51, 5  ;;  %v4521_v37 = vrot.slane %v7474_v43, 5  ;;  %v7799_v33 = vsel %vm6741_vm7, %v5570_v19, %v4511_v38  ;;  %v5287_v19 = vld [vmem:[%s6557_s27 + $0x78] sm:$0xf]  ;;  %v6454_v40 = vld [vmem:[%s6557_s27 + $0x70] sm:$0xf] }
  0xfd   : > { %v4513_v4 = vrot.slane %v4511_v38, 4  ;;  %v4514_v10 = vrot.slane %v7449_v25, 5  ;;  %v5572_v41 = vrot.slane %v5556_v8, 9  ;;  %v5535_v45 = vcombine.low %v4126_v34, %v4136_v22  ;;  %v6446_v8 = vld [vmem:[%s6557_s27 + $0x84] sm:$0xff]  }
  0xfe   : > { %5890 = vmatmul.mubr.msk.bf16.gmra.mrb[12].mxu1 %vm343_vm1, %v6443_v3  ;;  %v4508_v31 = vsel %vm6741_vm7, %v4506_v5, %v4507_v12  ;;  %v7808_v51 = vsel %vm6741_vm7, %v5571_v60, %v4518_v26  ;;  %v4520_v43 = vrot.slane %v4518_v26, 4  ;;  %v4525_v9 = vrot.slane %v7513_v61, 5  ;;  %v5558_v60 = vld [vmem:[%s6557_s27 + $0x60] sm:$0xe] }
  0xff   : > { %5893 = vmatprep.mubr.msk.bf16.mxu1 %vm343_vm1, %v6444_v6  ;;  %v4528_v25 = vrot.slane %v7516_v55, 5  ;;  %v5573_v18 = vrot.slane %v5557_v15, 9  ;;  %v4532_v35 = vrot.slane %v7535_v59, 5  ;;  %v4535_v23 = vrot.slane %v7542_v48, 5 }
 0x100   : > { %v7816_v2 = vsel %vm6741_vm7, %v4520_v43, %v4521_v37  ;;  %v2391_v36 = vshrl.u32 %v5284_v44, 16  ;;  %v2394_v53 = vshll.u32 %v5284_v44, 16  ;;  %v4515_v38 = vsel %vm6741_vm7, %v4513_v4, %v4514_v10 }
 0x101   : > { %v5588_v61 = vcombine.low %v7808_v51, %v7816_v2  ;;  %v7826_v55 = vsel %vm6741_vm7, %v5572_v41, %v4525_v9  ;;  %v4527_v59 = vrot.slane %v4525_v9, 4  ;;  %6042 = vmatmul.mubr.msk.bf16.gmra.mrb[28].mxu0 %vm343_vm1, %v5535_v45  ;;  %v7832_v48 = vsel %vm6741_vm7, %v5573_v18, %v4532_v35  ;;  %v6455_v45 = vld [vmem:[%s6557_s27 + $0x74] sm:$0x1] }
 0x102   : > { %v4534_v52 = vrot.slane %v4532_v35, 4  ;;  %v2393_v3 = vrot.slane %v2391_v36, 4  ;;  %v2400_v12 = vshll.u32 %v6454_v40, 16  ;;  %6047 = vmatprep.mubr.msk.bf16.mxu0 %vm343_vm1, %v5585_v17  ;;  %v2396_v34 = vrot.slane %v2394_v53, 5  ;;  %v5559_v17 = vld [vmem:[%s6557_s27 + $0x6c] sm:$0xe] }
 0x103   : > { %v7839_v6 = vsel %vm6741_vm7, %v4527_v59, %v4528_v25  ;;  %v2404_v5 = vshrl.u32 %v6454_v40, 16  ;;  %v2415_v22 = vshrl.u32 %v5287_v19, 16  ;;  %v5586_v26 = vcombine.low %v7790_v1, %v4508_v31  ;;  %v5290_v25 = vld [vmem:[%s6557_s27 + $0x84] sm:$0xf] }
 0x104   : > { %v5587_v37 = vcombine.low %v7799_v33, %v4515_v38  ;;  %v5589_v15 = vcombine.low %v7826_v55, %v7839_v6  ;;  %v7848_v4 = vsel %vm6741_vm7, %v4534_v52, %v4535_v23  ;;  %v7853_v41 = vrot.slane %v2400_v12, 5 }
 0x105   : > { %v5590_v10 = vcombine.low %v7832_v48, %v7848_v4  ;;  %v2406_v44 = vrot.slane %v2404_v5, 4  ;;  %v2410_v43 = vshll.u32 %v6455_v45, 16  ;;  %v2417_v1 = vrot.slane %v2415_v22, 4  ;;  %v5293_v22 = vld [vmem:[%s6557_s27 + $0x90] sm:$0xf] }
 0x106   : > { %5894 = vmatmul.mubr.msk.bf16.gmra.mrb[16].mxu1 %vm343_vm1, %v6445_v39  ;;  %v2418_v33 = vshll.u32 %v5287_v19, 16  ;;  %v2437_v31 = vsel %vm6614_vm4, %v7778_v56, %v7769_v0  ;;  %v5574_v9 = vrot.slane %v5558_v60, 9  ;;  %v2397_v18 = vor.u32 %v2396_v34, %v2393_v3  ;;  %v6448_v3 = vld [vmem:[%s6557_s27 + $0x9c] sm:$0xff]   ;;  %v6456_v34 = vld [vmem:[%s6557_s27 + $0x88] sm:$0xf] }
 0x107   : > { %5897 = vmatprep.mubr.msk.bf16.mxu1 %vm343_vm1, %v6446_v8  ;;  %v4539_v35 = vrot.slane %v7565_v13, 5  ;;  %v4542_v23 = vrot.slane %v7569_v30, 5  ;;  %v5575_v36 = vrot.slane %v5559_v17, 9  ;;  %v4546_v19 = vrot.slane %v7586_v62, 5  ;;  %v6447_v13 = vld [vmem:[%s6557_s27 + $0x90] sm:$0xff]  }
 0x108   : > { %v2420_v53 = vrot.slane %v2418_v33, 5  ;;  %v4549_v38 = vrot.slane %v7597_v57, 5  ;;  %v2407_v59 = vor.u32 %v2406_v44, %v7853_v41  ;;  %v2439_v39 = vshrl.u32 %v5290_v25, 16 }
 0x109   : > { %v7870_v0 = vsel %vm6741_vm7, %v5574_v9, %v4539_v35  ;;  %v4541_v56 = vrot.slane %v4539_v35, 4  ;;  %6048 = vmatmul.mubr.msk.bf16.vlgmr.msra.gmra.mrb[0].mxu0 %vm343_vm1, %v5586_v26  ;;  %v7876_v52 = vsel %vm6741_vm7, %v5575_v36, %v4546_v19  ;;  %v4548_v62 = vrot.slane %v4546_v19, 4  ;;  %v6457_v36 = vld [vmem:[%s6557_s27 + $0x8c] sm:$0x1]  ;;  %v6458_v19 = vld [vmem:[%s6557_s27 + $0x94] sm:$0xf] }
 0x10a   : > { %v2421_v30 = vor.u32 %v2420_v53, %v2417_v1  ;;  %v2442_v57 = vshll.u32 %v5290_v25, 16  ;;  %6051 = vmatprep.mubr.msk.bf16.mxu0 %vm343_vm1, %v5587_v37  ;;  %v7880_v40 = vrot.slane %v2397_v18, 4  ;;  %v7882_v12 = vrot.slane %v2410_v43, 5 }
 0x10b   : > { %v7886_v8 = vsel %vm6741_vm7, %v4541_v56, %v4542_v23  ;;  %v2448_v5 = vshll.u32 %v6456_v34, 16  ;;  %v7894_v17 = vsel %vm6741_vm7, %v4548_v62, %v4549_v38  ;;  %v2441_v37 = vrot.slane %v2439_v39, 4  ;;  %v5560_v56 = vld [vmem:[%s6557_s27 + $0x78] sm:$0xe] }
 0x10c   : > { %v2422_v60 = vrot.slane %v2421_v30, 4  ;;  %v5591_v26 = vcombine.low %v7870_v0, %v7886_v8  ;;  %v5592_v44 = vcombine.low %v7876_v52, %v7894_v17  ;;  %v2444_v45 = vrot.slane %v2442_v57, 5  ;;  %v6459_v57 = vld [vmem:[%s6557_s27 + $0x98] sm:$0x1]  ;;  %v6462_v0 = vld [vmem:[%s6557_s27 + $0xa4] sm:$0x1] }
 0x10d   : > { %v7898_v43 = vrot.slane %v2448_v5, 5  ;;  %v2452_v1 = vshrl.u32 %v6456_v34, 16  ;;  %v2408_v33 = vrot.slane %v2407_v59, 4  ;;  %v2463_v25 = vshrl.u32 %v5293_v22, 16 }
 0x10e   : > { %5898 = vmatmul.mubr.msk.bf16.gmra.mrb[20].mxu1 %vm343_vm1, %v6447_v13  ;;  %v2427_v9 = vsel %vm6614_vm4, %v2422_v60, %v6936_v63  ;;  %v2466_v18 = vshll.u32 %v5293_v22, 16  ;;  %v2458_v53 = vshll.u32 %v6457_v36, 16  ;;  %v2472_v38 = vshll.u32 %v6458_v19, 16 }
 0x10f   : > { %5901 = vmatprep.mubr.msk.bf16.mxu1 %vm343_vm1, %v6448_v3  ;;  %v7905_v35 = vcombine.low %v2427_v9, %v2437_v31  ;;  %v2454_v23 = vrot.slane %v2452_v1, 4  ;;  %v2445_v59 = vor.u32 %v2444_v45, %v2441_v37  ;;  %v2465_v39 = vrot.slane %v2463_v25, 4  ;;  %v6449_v31 = vld [vmem:[%s6557_s27 + $0xa8] sm:$0xff]   ;;  %v5561_v37 = vld [vmem:[%s6557_s27 + $0x84] sm:$0xe]  ;;  %v6450_v45 = vld [vmem:[%s6557_s27 + $0xb4] sm:$0xff]  }
 0x110   : > { %v2468_v13 = vrot.slane %v2466_v18, 5  ;;  %v2476_v63 = vshrl.u32 %v6458_v19, 16  ;;  %v7911_v62 = vrot.slane %v2472_v38, 5  ;;  %v2482_v3 = vshll.u32 %v6459_v57, 16 }
 0x111   : > { %v2455_v30 = vor.u32 %v2454_v23, %v7898_v43  ;;  %6052 = vmatmul.mubr.msk.bf16.gmra.mrb[4].mxu0 %vm343_vm1, %v5588_v61  ;;  %v5576_v22 = vrot.slane %v5560_v56, 9  ;;  %v4553_v60 = vrot.slane %v7607_v46, 5  ;;  %v2403_v51 = vsel %vm6614_vm4, %v7880_v40, %v7853_v41  ;;  %v6460_v56 = vld [vmem:[%s6557_s27 + $0xa0] sm:$0xf] }
 0x112   : > { %v2469_v34 = vor.u32 %v2468_v13, %v2465_v39  ;;  %v2478_v5 = vrot.slane %v2476_v63, 4  ;;  %6055 = vmatprep.mubr.msk.bf16.mxu0 %vm343_vm1, %v5589_v15  ;;  %v2413_v2 = vsel %vm6614_vm4, %v2408_v33, %v7882_v12  ;;  %v2460_v61 = vrot.slane %v2458_v53, 5  ;;  %v5296_v15 = vld [vmem:[%s6557_s27 + $0x9c] sm:$0xf]  ;;  %v5299_v13 = vld [vmem:[%s6557_s27 + $0xa8] sm:$0xf] }
 0x113   : > { %v4556_v1 = vrot.slane %v7615_v32, 5  ;;  %v2446_v46 = vrot.slane %v2445_v59, 4  ;;  %v7937_v55 = vsel %vm6741_vm7, %v5576_v22, %v4553_v60  ;;  %v4555_v6 = vrot.slane %v4553_v60, 4 }
 0x114   : > { %v2479_v9 = vor.u32 %v2478_v5, %v7911_v62  ;;  %v2456_v25 = vrot.slane %v2455_v30, 4  ;;  %v5577_v18 = vrot.slane %v5561_v37, 9  ;;  %v4560_v41 = vrot.slane %v7623_v7, 5  ;;  %v5562_v37 = vld [vmem:[%s6557_s27 + $0x90] sm:$0xe] }
 0x115   : > { %v4563_v40 = vrot.slane %v7637_v54, 5  ;;  %v2470_v32 = vrot.slane %v2469_v34, 4  ;;  %v2484_v33 = vrot.slane %v2482_v3, 5  ;;  %v7945_v23 = vsel %vm6741_vm7, %v4555_v6, %v4556_v1  ;;  %v5563_v1 = vld [vmem:[%s6557_s27 + $0x9c] sm:$0xe] }
 0x116   : > { %5902 = vmatmul.mubr.msk.bf16.gmra.mrb[24].mxu1 %vm343_vm1, %v6449_v31  ;;  %v2480_v12 = vrot.slane %v2479_v9, 4  ;;  %v5593_v36 = vcombine.low %v7937_v55, %v7945_v23  ;;  %v7952_v7 = vsel %vm6741_vm7, %v5577_v18, %v4560_v41  ;;  %v4562_v54 = vrot.slane %v4560_v41, 4  ;;  %v6451_v31 = vld [vmem:[%s6557_s27 + $0xc0] sm:$0xff]  }
 0x117   : > { %5905 = vmatprep.mubr.msk.bf16.mxu1 %vm343_vm1, %v6450_v45  ;;  %v2487_v53 = vshrl.u32 %v5296_v15, 16  ;;  %v5317_v19 = vcombine.low %v2403_v51, %v2413_v2  ;;  %v2490_v38 = vshll.u32 %v5296_v15, 16  ;;  %v2496_v59 = vshll.u32 %v6460_v56, 16  ;;  %v6461_v51 = vld [vmem:[%s6557_s27 + $0xac] sm:$0xf] }
 0x118   : > { %v2500_v39 = vshrl.u32 %v6460_v56, 16  ;;  %v2451_v63 = vsel %vm6614_vm4, %v2446_v46, %v7898_v43  ;;  %v2461_v30 = vsel %vm6614_vm4, %v2456_v25, %v2460_v61  ;;  %v7963_v57 = vsel %vm6741_vm7, %v4562_v54, %v4563_v40  ;;  %v5302_v54 = vld [vmem:[%s6557_s27 + $0xb4] sm:$0xf] }
 0x119   : > { %v2489_v3 = vrot.slane %v2487_v53, 4  ;;  %6056 = vmatmul.mubr.msk.bf16.gmra.mrb[8].mxu0 %vm343_vm1, %v5590_v10  ;;  %v5594_v34 = vcombine.low %v7952_v7, %v7963_v57  ;;  %v2492_v43 = vrot.slane %v2490_v38, 5  ;;  %v7972_v5 = vrot.slane %v2496_v59, 5 }
 0x11a   : > { %v2502_v22 = vrot.slane %v2500_v39, 4  ;;  %6059 = vmatprep.mubr.msk.bf16.mxu0 %vm343_vm1, %v5591_v26  ;;  %v2475_v48 = vsel %vm6614_vm4, %v2470_v32, %v7911_v62  ;;  %v2485_v4 = vsel %vm6614_vm4, %v2480_v12, %v2484_v33  ;;  %v2511_v10 = vshrl.u32 %v5299_v13, 16  ;;  %v6463_v26 = vld [vmem:[%s6557_s27 + $0xb0] sm:$0x1] }
 0x11b   : > { %v2514_v60 = vshll.u32 %v5299_v13, 16  ;;  %v2493_v45 = vor.u32 %v2492_v43, %v2489_v3  ;;  %v2520_v2 = vshll.u32 %v6461_v51, 16  ;;  %v2524_v61 = vshrl.u32 %v6461_v51, 16 }
 0x11c   : > { %v2503_v46 = vor.u32 %v2502_v22, %v7972_v5  ;;  %v2506_v8 = vshll.u32 %v6462_v0, 16  ;;  %v2530_v9 = vshll.u32 %v6463_v26, 16  ;;  %v5319_v62 = vcombine.low %v2451_v63, %v2461_v30 }
 0x11d   : > { %v7990_v55 = vcombine.low %v2475_v48, %v2485_v4  ;;  %v2513_v6 = vrot.slane %v2511_v10, 4  ;;  %v5578_v15 = vrot.slane %v5562_v37, 9  ;;  %v2516_v25 = vrot.slane %v2514_v60, 5  ;;  %v6465_v10 = vld [vmem:[%s6557_s27 + $0xbc] sm:$0x1] }
 0x11e   : > { %5906 = vmatmul.mubr.msk.bf16.gmra.mrb[28].mxu1 %vm343_vm1, %v6451_v31  ;;  %v4567_v18 = vrot.slane %v7644_v28, 5  ;;  %v4570_v41 = vrot.slane %v7654_v49, 5  ;;  %v5579_v40 = vrot.slane %v5563_v1, 9  ;;  %v2494_v32 = vrot.slane %v2493_v45, 4 }
 0x11f   : > { %5927 = vmatprep.mubr.msk.bf16.mxu1 %vm343_vm1, %v5317_v19  ;;  %v7995_v12 = vrot.slane %v2520_v2, 5  ;;  %v2526_v33 = vrot.slane %v2524_v61, 4  ;;  %v4574_v23 = vrot.slane %v7661_v20, 5  ;;  %v2504_v53 = vrot.slane %v2503_v46, 4  ;;  %v6466_v2 = vld [vmem:[%s6557_s27 + $0xc4] sm:$0xf] }
 0x120   : > { %v2508_v38 = vrot.slane %v2506_v8, 5  ;;  %v7999_v56 = vrot.slane %v2530_v9, 5  ;;  %v4569_v19 = vrot.slane %v4567_v18, 4  ;;  %v4568_v28 = vsel %vm6741_vm7, %v5578_v15, %v4567_v18  ;;  %v5564_v46 = vld [vmem:[%s6557_s27 + $0xa8] sm:$0xe] }
 0x121   : > { %6060 = vmatmul.mubr.msk.bf16.gmra.mrb[12].mxu0 %vm343_vm1, %v5592_v44  ;;  %v8009_v49 = vsel %vm6741_vm7, %v5579_v40, %v4574_v23  ;;  %v4576_v20 = vrot.slane %v4574_v23, 4  ;;  %v4577_v59 = vrot.slane %v7673_v11, 5  ;;  %v2517_v39 = vor.u32 %v2516_v25, %v2513_v6  ;;  %v5305_v44 = vld [vmem:[%s6557_s27 + $0xc0] sm:$0xf]  ;;  %v6464_v11 = vld [vmem:[%s6557_s27 + $0xb8] sm:$0xf] }
 0x122   : > { %6063 = vmatprep.mubr.msk.bf16.mxu0 %vm343_vm1, %v5593_v36  ;;  %v4571_v13 = vsel %vm6741_vm7, %v4569_v19, %v4570_v41  ;;  %v2535_v52 = vshrl.u32 %v5302_v54, 16  ;;  %v2538_v17 = vshll.u32 %v5302_v54, 16  ;;  %v2499_v63 = vsel %vm6614_vm4, %v2494_v32, %v7972_v5 }
 0x123   : > { %v2527_v30 = vor.u32 %v2526_v33, %v7995_v12  ;;  %v8022_v3 = vsel %vm6741_vm7, %v4576_v20, %v4577_v59  ;;  %v2544_v36 = vshll.u32 %v6464_v11, 16  ;;  %v5595_v31 = vcombine.low %v4568_v28, %v4571_v13  ;;  %v5566_v20 = vld [vmem:[%s6557_s27 + $0xc0] sm:$0xe] }
 0x124   : > { %v5596_v43 = vcombine.low %v8009_v49, %v8022_v3  ;;  %v2537_v22 = vrot.slane %v2535_v52, 4  ;;  %v2540_v48 = vrot.slane %v2538_v17, 5  ;;  %v2548_v4 = vshrl.u32 %v6464_v11, 16  ;;  %v5567_v52 = vld [vmem:[%s6557_s27 + $0xcc] sm:$0xe] }
 0x125   : > { %v2546_v5 = vrot.slane %v2544_v36, 5  ;;  %v2554_v60 = vshll.u32 %v6465_v10, 16  ;;  %v2559_v37 = vshrl.u32 %v5305_v44, 16  ;;  %v2562_v51 = vshll.u32 %v5305_v44, 16 }
 0x126   : > { %5928 = vmatmul.mubr.msk.bf16.vlgmr.msra.gmra.mrb[16].mxu1 %vm343_vm1, %v7905_v35  ;;  %v2541_v45 = vor.u32 %v2540_v48, %v2537_v22  ;;  %v2568_v61 = vshll.u32 %v6466_v2, 16  ;;  %v2572_v1 = vshrl.u32 %v6466_v2, 16  ;;  %v2509_v0 = vsel %vm6614_vm4, %v2504_v53, %v2508_v38  ;;  %v6467_v53 = vld [vmem:[%s6557_s27 + $0xc8] sm:$0x1] }
 0x127   : > { %5931 = vmatprep.mubr.msk.bf16.mxu1 %vm343_vm1, %v5319_v62  ;;  %v2518_v8 = vrot.slane %v2517_v39, 4  ;;  %v2528_v26 = vrot.slane %v2527_v30, 4  ;;  %v2550_v35 = vrot.slane %v2548_v4, 4  ;;  %v2561_v6 = vrot.slane %v2559_v37, 4 }
 0x128   : > { %v2542_v9 = vrot.slane %v2541_v45, 4  ;;  %v2564_v15 = vrot.slane %v2562_v51, 5  ;;  %v2570_v25 = vrot.slane %v2568_v61, 5  ;;  %v2574_v18 = vrot.slane %v2572_v1, 4 }
 0x129   : > { %6064 = vmatmul.mubr.msk.bf16.gmra.mrb[16].mxu0 %vm343_vm1, %v5594_v34  ;;  %v2551_v62 = vor.u32 %v2550_v35, %v2546_v5  ;;  %v5580_v41 = vrot.slane %v5564_v46, 9  ;;  %v4581_v40 = vrot.slane %v7686_v27, 5  ;;  %v5321_v32 = vcombine.low %v2499_v63, %v2509_v0  ;;  %v5565_v34 = vld [vmem:[%s6557_s27 + $0xb4] sm:$0xe] }
 0x12a   : > { %6067 = vmatprep.mubr.msk.bf16.mxu0 %vm343_vm1, %v5595_v31  ;;  %v2556_v33 = vrot.slane %v2554_v60, 5  ;;  %v4584_v23 = vrot.slane %v7691_v58, 5  ;;  %v2578_v38 = vshll.u32 %v6467_v53, 16  ;;  %v2523_v19 = vsel %vm6614_vm4, %v2518_v8, %v7995_v12 }
 0x12b   : > { %v2552_v54 = vrot.slane %v2551_v62, 4  ;;  %v4582_v7 = vsel %vm6741_vm7, %v5580_v41, %v4581_v40  ;;  %v4583_v57 = vrot.slane %v4581_v40, 4  ;;  %v2533_v27 = vsel %vm6614_vm4, %v2528_v26, %v7999_v56 }
 0x12c   : > { %v2547_v58 = vsel %vm6614_vm4, %v2542_v9, %v2546_v5  ;;  %v4588_v28 = vrot.slane %v7703_v16, 5  ;;  %v2565_v59 = vor.u32 %v2564_v15, %v2561_v6  ;;  %v2575_v39 = vor.u32 %v2574_v18, %v2570_v25 }
 0x12d   : > { %v4585_v13 = vsel %vm6741_vm7, %v4583_v57, %v4584_v23  ;;  %v4595_v12 = vrot.slane %v7721_v24, 5  ;;  %v2557_v56 = vsel %vm6614_vm4, %v2552_v54, %v2556_v33  ;;  %v5581_v44 = vrot.slane %v5565_v34, 9 }
 0x12e   : > { %5932 = vmatmul.mubr.msk.bf16.gmra.mrb[20].mxu1 %vm343_vm1, %v7990_v55  ;;  %v5597_v17 = vcombine.low %v4582_v7, %v4585_v13  ;;  %v4591_v16 = vrot.slane %v7708_v50, 5  ;;  %v5322_v63 = vcombine.low %v2523_v19, %v2533_v27  ;;  %v2580_v30 = vrot.slane %v2578_v38, 5 }
 0x12f   : > { %5935 = vmatprep.mubr.msk.bf16.mxu1 %vm343_vm1, %v5321_v32  ;;  %v4590_v55 = vrot.slane %v4588_v28, 4  ;;  %v5582_v11 = vrot.slane %v5566_v20, 9  ;;  %v4597_v36 = vrot.slane %v4595_v12, 4  ;;  %v4598_v31 = vrot.slane %v7724_v21, 5  ;;  %v8107_v32 = vld [vmem:[%s8194_s2] ss:$0 sm:$0xff] }
 0x130   : > { %v5583_v22 = vrot.slane %v5567_v52, 9  ;;  %v4602_v24 = vrot.slane %v7737_v14, 5  ;;  %v5323_v48 = vcombine.low %v2547_v58, %v2557_v56  ;;  %v2566_v5 = vrot.slane %v2565_v59, 4 }
 0x131   : > { %6068 = vmatmul.mubr.msk.bf16.gmra.mrb[20].mxu0 %vm343_vm1, %v5596_v43  ;;  %v2576_v4 = vrot.slane %v2575_v39, 4  ;;  %v4605_v50 = vrot.slane %v7740_v29, 5  ;;  %v4589_v10 = vsel %vm6741_vm7, %v5581_v44, %v4588_v28  ;;  %v4592_v21 = vsel %vm6741_vm7, %v4590_v55, %v4591_v16 }
 0x132   : > { %6071 = vmatprep.mubr.msk.bf16.mxu0 %vm343_vm1, %v5597_v17  ;;  %v4603_v14 = vsel %vm6741_vm7, %v5583_v22, %v4602_v24  ;;  %v4604_v60 = vrot.slane %v4602_v24, 4  ;;  %v4596_v49 = vsel %vm6741_vm7, %v5582_v11, %v4595_v12  ;;  %v4599_v3 = vsel %vm6741_vm7, %v4597_v36, %v4598_v31 }
 0x133   : > { %v5598_v43 = vcombine.low %v4589_v10, %v4592_v21  ;;  %v2571_v45 = vsel %vm6614_vm4, %v2566_v5, %v2570_v25  ;;  %v2581_v51 = vsel %vm6614_vm4, %v2576_v4, %v2580_v30  ;;  %v5599_v2 = vcombine.low %v4596_v49, %v4599_v3 }
 0x134   : > { %v4606_v29 = vsel %vm6741_vm7, %v4604_v60, %v4605_v50  ;;  %v5324_v61 = vcombine.low %v2571_v45, %v2581_v51 }
 0x135   : > { %v5600_v37 = vcombine.low %v4603_v14, %v4606_v29 }
 0x136   : > { %5936 = vmatmul.mubr.msk.bf16.gmra.mrb[24].mxu1 %vm343_vm1, %v5322_v63 }
 0x137   : > { %5939 = vmatprep.mubr.msk.bf16.mxu1 %vm343_vm1, %v5323_v48 }
 0x139   : > { %6072 = vmatmul.mubr.msk.bf16.gmra.mrb[24].mxu0 %vm343_vm1, %v5598_v43 }
 0x13a   : > { %6075 = vmatprep.mubr.msk.bf16.mxu0 %vm343_vm1, %v5599_v2 }
 0x13e   : > { %5940 = vmatmul.mubr.msk.bf16.gmra.mrb[28].mxu1 %vm343_vm1, %v5324_v61 }
 0x141   : > { %6076 = vmatmul.mubr.msk.bf16.gmra.mrb[28].mxu0 %vm343_vm1, %v5600_v37 }
 0x1b9   : > { %v5879_v47 = vpop.f32.mrb[0].mxu1 }
 0x1ba   : > { %v1991_v1 = vpop.f32.mrb[1].mxu1  ;;  %v6081_v33 = vadd.f32 %v5879_v47, %v8107_v32 }
 0x1bb   : > { %v5880_v46 = vpop.f32.mrb[2].mxu1  ;;  %v6083_v23 = vadd.f32 %v8107_v32, %v1991_v1 }
 0x1bc   : > { %v1994_v0 = vpop.f32.mrb[3].mxu1  ;;  %v6085_v53 = vadd.f32 %v5880_v46, %v8107_v32 }
 0x1bd   : > { %v6087_v57 = vadd.f32 %v8107_v32, %v1994_v0 }
 0x1c1   : > { %v5883_v8 = vpop.f32.mrb[4].mxu1 }
 0x1c2   : > { %v2007_v26 = vpop.f32.mrb[5].mxu1  ;;  %v6089_v12 = vadd.f32 %v5883_v8, %v8107_v32 }
 0x1c3   : > { %v5884_v35 = vpop.f32.mrb[6].mxu1  ;;  %v6091_v52 = vadd.f32 %v8107_v32, %v2007_v26 }
 0x1c4   : > { %v2010_v42 = vpop.f32.mrb[7].mxu1  ;;  %v6093_v17 = vadd.f32 %v5884_v35, %v8107_v32 }
 0x1c5   : > { %v6095_v63 = vadd.f32 %v8107_v32, %v2010_v42 }
 0x1c9   : > { %v5887_v9 = vpop.f32.mrb[8].mxu1 }
 0x1ca   : > { %v2023_v6 = vpop.f32.mrb[9].mxu1  ;;  %v6097_v4 = vadd.f32 %v5887_v9, %v8107_v32 }
 0x1cb   : > { %v5888_v15 = vpop.f32.mrb[10].mxu1  ;;  %v6099_v50 = vadd.f32 %v8107_v32, %v2023_v6 }
 0x1cc   : > { %v2026_v25 = vpop.f32.mrb[11].mxu1  ;;  %v6101_v21 = vadd.f32 %v5888_v15, %v8107_v32 }
 0x1cd   : > { %v6103_v49 = vadd.f32 %v8107_v32, %v2026_v25 }
 0x1d1   : > { %v8096_v62 = vpop.f32.mrb[12].mxu1 }
 0x1d2   : > { %v8098_v18 = vpop.f32.mrb[13].mxu1  ;;  %v6105_v1 = vadd.f32 %v8096_v62, %v8107_v32 }
 0x1d3   : > { %v8100_v41 = vpop.f32.mrb[14].mxu1  ;;  %v6107_v46 = vadd.f32 %v8107_v32, %v8098_v18 }
 0x1d4   : > { %v8102_v40 = vpop.f32.mrb[15].mxu1  ;;  %v6109_v8 = vadd.f32 %v8100_v41, %v8107_v32 }
 0x1d5   : > { %v6111_v42 = vadd.f32 %v8107_v32, %v8102_v40 }
 0x1dc   : > { %v6049_v54 = vpop.f32.mrb[0].mxu0 }
 0x1dd   : > { %v6082_v38 = vadd.f32 %v6081_v33, %v6049_v54  ;;  %v4742_v7 = vpop.f32.mrb[1].mxu0 }
 0x1de   : > { %v6084_v34 = vadd.f32 %v6083_v23, %v4742_v7  ;;  %v6050_v19 = vpop.f32.mrb[2].mxu0 }
 0x1df   : > { %v4903_v27 = vmax.f32 %v6082_v38, 0.0  ;;  %v6086_v58 = vadd.f32 %v6085_v53, %v6050_v19  ;;  %v4745_v28 = vpop.f32.mrb[3].mxu0 }
 0x1e0   : > { %v4901_v20 = vmax.f32 %v6084_v34, 0.0  ;;  %v6088_v59 = vadd.f32 %v6087_v57, %v4745_v28 }
 0x1e1   : > { %4935 = vst [vmem:[%s8117_s22 + $0x10] sm:$0xff] %v4903_v27  ;;  %v4904_v39 = vmax.f32 %v6086_v58, 0.0 }
 0x1e2   : > { %4933 = vst [vmem:[%s8117_s22] sm:$0xff] %v4901_v20  ;;  %v4902_v13 = vmax.f32 %v6088_v59, 0.0 }
 0x1e3   : > { %4936 = vst [vmem:[%s8117_s22 + $0x18] sm:$0xff] %v4904_v39 }
 0x1e4   : > { %4934 = vst [vmem:[%s8117_s22 + $0x8] sm:$0xff] %v4902_v13  ;;  %v6053_v56 = vpop.f32.mrb[4].mxu0 }
 0x1e5   : > { %v6090_v44 = vadd.f32 %v6089_v12, %v6053_v56  ;;  %v4758_v16 = vpop.f32.mrb[5].mxu0 }
 0x1e6   : > { %v6092_v30 = vadd.f32 %v6091_v52, %v4758_v16  ;;  %v6054_v55 = vpop.f32.mrb[6].mxu0 }
 0x1e7   : > { %v4907_v11 = vmax.f32 %v6090_v44, 0.0  ;;  %v6094_v36 = vadd.f32 %v6093_v17, %v6054_v55  ;;  %v4761_v31 = vpop.f32.mrb[7].mxu0 }
 0x1e8   : > { %v4905_v22 = vmax.f32 %v6092_v30, 0.0  ;;  %v6096_v24 = vadd.f32 %v6095_v63, %v4761_v31 }
 0x1e9   : > { %4939 = vst [vmem:[%s8117_s22 + $0x30] sm:$0xff] %v4907_v11  ;;  %v4908_v48 = vmax.f32 %v6094_v36, 0.0 }
 0x1ea   : > { %4937 = vst [vmem:[%s8117_s22 + $0x20] sm:$0xff] %v4905_v22  ;;  %v4906_v5 = vmax.f32 %v6096_v24, 0.0 }
 0x1eb   : > { %4940 = vst [vmem:[%s8117_s22 + $0x38] sm:$0xff] %v4908_v48 }
 0x1ec   : > { %4938 = vst [vmem:[%s8117_s22 + $0x28] sm:$0xff] %v4906_v5  ;;  %v6057_v10 = vpop.f32.mrb[8].mxu0 }
 0x1ed   : > { %v6098_v14 = vadd.f32 %v6097_v4, %v6057_v10  ;;  %v4774_v60 = vpop.f32.mrb[9].mxu0 }
 0x1ee   : > { %v6100_v3 = vadd.f32 %v6099_v50, %v4774_v60  ;;  %v6058_v29 = vpop.f32.mrb[10].mxu0 }
 0x1ef   : > { %v4911_v43 = vmax.f32 %v6098_v14, 0.0  ;;  %v6102_v37 = vadd.f32 %v6101_v21, %v6058_v29  ;;  %v4777_v45 = vpop.f32.mrb[11].mxu0 }
 0x1f0   : > { %v4909_v51 = vmax.f32 %v6100_v3, 0.0  ;;  %v6104_v2 = vadd.f32 %v6103_v49, %v4777_v45 }
 0x1f1   : > { %4943 = vst [vmem:[%s8117_s22 + $0x50] sm:$0xff] %v4911_v43  ;;  %v4912_v61 = vmax.f32 %v6102_v37, 0.0 }
 0x1f2   : > { %4941 = vst [vmem:[%s8117_s22 + $0x40] sm:$0xff] %v4909_v51  ;;  %v4910_v47 = vmax.f32 %v6104_v2, 0.0 }
 0x1f3   : > { %4944 = vst [vmem:[%s8117_s22 + $0x58] sm:$0xff] %v4912_v61 }
 0x1f4   : > { %4942 = vst [vmem:[%s8117_s22 + $0x48] sm:$0xff] %v4910_v47  ;;  %v6061_v0 = vpop.f32.mrb[12].mxu0 }
 0x1f5   : > { %v6106_v26 = vadd.f32 %v6105_v1, %v6061_v0  ;;  %v4790_v35 = vpop.f32.mrb[13].mxu0 }
 0x1f6   : > { %v6108_v9 = vadd.f32 %v6107_v46, %v4790_v35  ;;  %v6062_v6 = vpop.f32.mrb[14].mxu0 }
 0x1f7   : > { %v4915_v15 = vmax.f32 %v6106_v26, 0.0  ;;  %v6110_v25 = vadd.f32 %v6109_v8, %v6062_v6  ;;  %v4793_v62 = vpop.f32.mrb[15].mxu0 }
 0x1f8   : > { %v4913_v33 = vmax.f32 %v6108_v9, 0.0  ;;  %v6112_v23 = vadd.f32 %v6111_v42, %v4793_v62 }
 0x1f9   : > { %v5929_v18 = vpop.f32.mrb[16].mxu1  ;;  %4947 = vst [vmem:[%s8117_s22 + $0x70] sm:$0xff] %v4915_v15  ;;  %v4916_v53 = vmax.f32 %v6110_v25, 0.0 }
 0x1fa   : > { %v2781_v54 = vpop.f32.mrb[17].mxu1  ;;  %4945 = vst [vmem:[%s8117_s22 + $0x60] sm:$0xff] %v4913_v33  ;;  %v4914_v38 = vmax.f32 %v6112_v23, 0.0  ;;  %v6113_v7 = vadd.f32 %v5929_v18, %v8107_v32 }
 0x1fb   : > { %v5930_v41 = vpop.f32.mrb[18].mxu1  ;;  %4948 = vst [vmem:[%s8117_s22 + $0x78] sm:$0xff] %v4916_v53  ;;  %v6115_v40 = vadd.f32 %v8107_v32, %v2781_v54 }
 0x1fc   : > { %v2784_v57 = vpop.f32.mrb[19].mxu1  ;;  %4946 = vst [vmem:[%s8117_s22 + $0x68] sm:$0xff] %v4914_v38  ;;  %v6065_v34 = vpop.f32.mrb[16].mxu0  ;;  %v6117_v19 = vadd.f32 %v5930_v41, %v8107_v32 }
 0x1fd   : > { %v6114_v27 = vadd.f32 %v6113_v7, %v6065_v34  ;;  %v4806_v58 = vpop.f32.mrb[17].mxu0  ;;  %v6119_v28 = vadd.f32 %v8107_v32, %v2784_v57 }
 0x1fe   : > { %v6116_v20 = vadd.f32 %v6115_v40, %v4806_v58  ;;  %v6066_v59 = vpop.f32.mrb[18].mxu0 }
 0x1ff   : > { %v4919_v39 = vmax.f32 %v6114_v27, 0.0  ;;  %v6118_v13 = vadd.f32 %v6117_v19, %v6066_v59  ;;  %v4809_v12 = vpop.f32.mrb[19].mxu0 }
 0x200   : > { %v4917_v56 = vmax.f32 %v6116_v20, 0.0  ;;  %v6120_v17 = vadd.f32 %v6119_v28, %v4809_v12 }
 0x201   : > { %v5933_v52 = vpop.f32.mrb[20].mxu1  ;;  %4951 = vst [vmem:[%s8117_s22 + $0x90] sm:$0xff] %v4919_v39  ;;  %v4920_v16 = vmax.f32 %v6118_v13, 0.0 }
 0x202   : > { %v2797_v44 = vpop.f32.mrb[21].mxu1  ;;  %4949 = vst [vmem:[%s8117_s22 + $0x80] sm:$0xff] %v4917_v56  ;;  %v4918_v30 = vmax.f32 %v6120_v17, 0.0  ;;  %v6121_v55 = vadd.f32 %v5933_v52, %v8107_v32 }
 0x203   : > { %v5934_v63 = vpop.f32.mrb[22].mxu1  ;;  %4952 = vst [vmem:[%s8117_s22 + $0x98] sm:$0xff] %v4920_v16  ;;  %v6123_v36 = vadd.f32 %v8107_v32, %v2797_v44 }
 0x204   : > { %v2800_v11 = vpop.f32.mrb[23].mxu1  ;;  %4950 = vst [vmem:[%s8117_s22 + $0x88] sm:$0xff] %v4918_v30  ;;  %v6069_v31 = vpop.f32.mrb[20].mxu0  ;;  %v6125_v22 = vadd.f32 %v5934_v63, %v8107_v32 }
 0x205   : > { %v6122_v24 = vadd.f32 %v6121_v55, %v6069_v31  ;;  %v4822_v48 = vpop.f32.mrb[21].mxu0  ;;  %v6127_v5 = vadd.f32 %v8107_v32, %v2800_v11 }
 0x206   : > { %v6124_v4 = vadd.f32 %v6123_v36, %v4822_v48  ;;  %v6070_v50 = vpop.f32.mrb[22].mxu0 }
 0x207   : > { %v4923_v10 = vmax.f32 %v6122_v24, 0.0  ;;  %v6126_v21 = vadd.f32 %v6125_v22, %v6070_v50  ;;  %v4825_v14 = vpop.f32.mrb[23].mxu0 }
 0x208   : > { %v4921_v49 = vmax.f32 %v6124_v4, 0.0  ;;  %v6128_v3 = vadd.f32 %v6127_v5, %v4825_v14 }
 0x209   : > { %v5937_v60 = vpop.f32.mrb[24].mxu1  ;;  %4955 = vst [vmem:[%s8117_s22 + $0xb0] sm:$0xff] %v4923_v10  ;;  %v4924_v43 = vmax.f32 %v6126_v21, 0.0 }
 0x20a   : > { %v2813_v29 = vpop.f32.mrb[25].mxu1  ;;  %4953 = vst [vmem:[%s8117_s22 + $0xa0] sm:$0xff] %v4921_v49  ;;  %v4922_v45 = vmax.f32 %v6128_v3, 0.0  ;;  %v6129_v51 = vadd.f32 %v5937_v60, %v8107_v32 }
 0x20b   : > { %v5938_v37 = vpop.f32.mrb[26].mxu1  ;;  %4956 = vst [vmem:[%s8117_s22 + $0xb8] sm:$0xff] %v4924_v43  ;;  %v6131_v61 = vadd.f32 %v8107_v32, %v2813_v29 }
 0x20c   : > { %v2816_v2 = vpop.f32.mrb[27].mxu1  ;;  %4954 = vst [vmem:[%s8117_s22 + $0xa8] sm:$0xff] %v4922_v45  ;;  %v6073_v47 = vpop.f32.mrb[24].mxu0  ;;  %v6133_v1 = vadd.f32 %v5938_v37, %v8107_v32 }
 0x20d   : > { %v6130_v46 = vadd.f32 %v6129_v51, %v6073_v47  ;;  %v4838_v0 = vpop.f32.mrb[25].mxu0  ;;  %v6135_v8 = vadd.f32 %v8107_v32, %v2816_v2 }
 0x20e   : > { %v6132_v26 = vadd.f32 %v6131_v61, %v4838_v0  ;;  %v6074_v35 = vpop.f32.mrb[26].mxu0 }
 0x20f   : > { %v4927_v42 = vmax.f32 %v6130_v46, 0.0  ;;  %v6134_v9 = vadd.f32 %v6133_v1, %v6074_v35  ;;  %v4841_v6 = vpop.f32.mrb[27].mxu0 }
 0x210   : > { %v4925_v25 = vmax.f32 %v6132_v26, 0.0  ;;  %v6136_v62 = vadd.f32 %v6135_v8, %v4841_v6 }
 0x211   : > { %v5941_v15 = vpop.f32.mrb[28].mxu1  ;;  %4959 = vst [vmem:[%s8117_s22 + $0xd0] sm:$0xff] %v4927_v42  ;;  %v4928_v33 = vmax.f32 %v6134_v9, 0.0 }
 0x212   : > { %v2829_v18 = vpop.f32.mrb[29].mxu1  ;;  %4957 = vst [vmem:[%s8117_s22 + $0xc0] sm:$0xff] %v4925_v25  ;;  %v4926_v54 = vmax.f32 %v6136_v62, 0.0  ;;  %v6137_v53 = vadd.f32 %v5941_v15, %v8107_v32 }
 0x213   : > { %v5942_v23 = vpop.f32.mrb[30].mxu1  ;;  %4960 = vst [vmem:[%s8117_s22 + $0xd8] sm:$0xff] %v4928_v33  ;;  %v6139_v38 = vadd.f32 %v8107_v32, %v2829_v18 }
 0x214   : > { %v2832_v41 = vpop.f32.mrb[31].mxu1  ;;  %4958 = vst [vmem:[%s8117_s22 + $0xc8] sm:$0xff] %v4926_v54  ;;  %v6077_v7 = vpop.f32.mrb[28].mxu0  ;;  %v6141_v57 = vadd.f32 %v5942_v23, %v8107_v32 }
 0x215   : > { %v6138_v40 = vadd.f32 %v6137_v53, %v6077_v7  ;;  %v4854_v34 = vpop.f32.mrb[29].mxu0  ;;  %v6143_v19 = vadd.f32 %v8107_v32, %v2832_v41 }
 0x216   : > { %v6140_v27 = vadd.f32 %v6139_v38, %v4854_v34  ;;  %v6078_v58 = vpop.f32.mrb[30].mxu0 }
 0x217   : > { %v4931_v28 = vmax.f32 %v6138_v40, 0.0  ;;  %v6142_v20 = vadd.f32 %v6141_v57, %v6078_v58  ;;  %v4857_v59 = vpop.f32.mrb[31].mxu0 }
 0x218   : > { %v4929_v39 = vmax.f32 %v6140_v27, 0.0  ;;  %v6144_v13 = vadd.f32 %v6143_v19, %v4857_v59 }
 0x219   : > { %4963 = vst [vmem:[%s8117_s22 + $0xf0] sm:$0xff] %v4931_v28  ;;  %v4932_v12 = vmax.f32 %v6142_v20, 0.0 }
 0x21a   : > { %4961 = vst [vmem:[%s8117_s22 + $0xe0] sm:$0xff] %v4929_v39  ;;  %v4930_v52 = vmax.f32 %v6144_v13, 0.0 }
 0x21b   : > { %4964 = vst [vmem:[%s8117_s22 + $0xf8] sm:$0xff] %v4932_v12 }
 0x21c   : > { %4962 = vst [vmem:[%s8117_s22 + $0xe8] sm:$0xff] %v4930_v52 }
 0x21d PF: > { %s13_s14 = sadd.s32 1, %s6490_s14   ;;  %s8202_s12 = smov %s6486_s13 }
 0x21e   : > { %p10_p5 = scmp.ge.s32.totalorder %s13_s14, 4   ;;  %s8203_s13 = smov %s8205_s15 }
 0x220   :  { %12 = sbr.rel (!%p10_p5) target bundleno = 2 (0x2), region = 78 }

</bundles_post_ra>
